<compile_context>
chip_gen: v7x
topology: tpu7x:2x2x1
jax: 0.10.0
libtpu: 0.0.40
codegen_flags: <defaults>
</compile_context>

<pallas_src>
import functools

import jax
import jax.numpy as jnp
import numpy as np
from jax import lax
from jax.experimental import pallas as pl
from jax.experimental.pallas import tpu as pltpu

BIG_NEG = 1.0e12


def _global_pointer_kernel(x_ref, xt_ref, wq_ref, wkt_ref, bq_ref, bkt_ref,
                           sq_ref, cq_ref, sk_ref, ck_ref, am_ref, out_ref):
    # Per grid step (one batch element b, one block of EB entity types):
    #   x_ref   : (1, Lp, H)        bf16   activations (query side)
    #   xt_ref  : (1, H, Lp)        bf16   activations transposed (key side)
    #   wq_ref  : (1, H, EB*D)      bf16   [h1 ent-major | h2 ent-major], scale folded
    #   wkt_ref : (1, EB*D, H)      bf16   same row order, transposed
    #   bq_ref  : (1, 1, EB*D)      f32    (scale folded in)
    #   bkt_ref : (1, EB*D, 1)      f32
    #   sq_ref  : (Lp, EB*D2)       f32    sin tiled per entity (query layout)
    #   cq_ref  : (Lp, EB*D2)       f32
    #   sk_ref  : (EB*D2, Lp)       f32    sin tiled per entity (key/transposed layout)
    #   ck_ref  : (EB*D2, Lp)       f32
    #   am_ref  : (1, 1, Lp)        f32    key padding along lanes
    #   out_ref : (1, EB, Lp, Lp)
    EB = out_ref.shape[1]
    Lp = out_ref.shape[2]
    EBD2 = sq_ref.shape[1]
    D2 = EBD2 // EB
    D = 2 * D2
    neg_big = BIG_NEG / (D ** 0.5)       # 1/sqrt(D) folded into the additive mask

    x = x_ref[0]                         # (Lp, H)  bf16
    xt = xt_ref[0]                       # (H, Lp)  bf16

    # Dense projection (nn.Linear) on the MXU, bf16 operands, f32 accumulate.
    # Q in natural (rows = query positions) layout, K directly transposed
    # (columns = key positions) so the score matmuls need no transpose.
    q = jnp.dot(x, wq_ref[0], preferred_element_type=jnp.float32) + bq_ref[0]      # (Lp, EB*D)
    kt = jnp.dot(wkt_ref[0], xt, preferred_element_type=jnp.float32) + bkt_ref[0]  # (EB*D, Lp)

    sinq = sq_ref[...]
    cosq = cq_ref[...]
    sink = sk_ref[...]
    cosk = ck_ref[...]
    pad_row = am_ref[0]                  # (1, Lp)

    # Vectorized rotary across the whole entity block (one lane-dense pass).
    q1 = q[:, :EBD2]
    q2 = q[:, EBD2:]
    k1 = kt[:EBD2, :]
    k2 = kt[EBD2:, :]

    qr1 = q1 * cosq - q2 * sinq                          # (Lp, EB*D2)
    qr2 = q2 * cosq + q1 * sinq
    # Fold key padding into the rotated keys (zero column -> zero score
    # contribution, identical to logits * pad in the reference).
    kr1 = (k1 * cosk - k2 * sink) * pad_row              # (EB*D2, Lp)
    kr2 = (k2 * cosk + k1 * sink) * pad_row

    qr1 = qr1.astype(jnp.bfloat16)
    qr2 = qr2.astype(jnp.bfloat16)
    kr1 = kr1.astype(jnp.bfloat16)
    kr2 = kr2.astype(jnp.bfloat16)

    # Additive mask (key padding + strict lower triangle), built once per grid
    # step; the 1/sqrt(D) scale is already folded into neg_big.
    row = lax.broadcasted_iota(jnp.int32, (Lp, Lp), 0)
    col = lax.broadcasted_iota(jnp.int32, (Lp, Lp), 1)
    tril = (row > col).astype(jnp.float32)
    mask_sub = ((1.0 - pad_row) + tril) * neg_big        # (Lp, Lp)

    for e in range(EB):                  # small static block of entity types
        lo = e * D2
        hi = lo + D2
        # S_e = QR_e . KR_e^T, contracted over both rotary halves; each matmul
        # is in natural MXU orientation with contiguous operand slices.
        s = jnp.dot(qr1[:, lo:hi], kr1[lo:hi, :], preferred_element_type=jnp.float32)
        s = s + jnp.dot(qr2[:, lo:hi], kr2[lo:hi, :], preferred_element_type=jnp.float32)
        out_ref[0, e] = (s - mask_sub).astype(out_ref.dtype)


def _vmem_capacity_bytes():
    try:
        info = pltpu.get_tpu_info()
        cap = getattr(info, "vmem_capacity_bytes", None)
        if cap:
            return int(cap)
    except Exception:
        pass
    return 128 * 2 ** 20     # v5e/v6e default


def _block_vmem_bytes(eb, Lp, H, D, out_itemsize):
    """Rough per-grid-step VMEM footprint for entity-block size eb."""
    D2 = D // 2
    ebd = eb * D
    return int(
        2 * eb * Lp * Lp * out_itemsize        # output block, double-buffered
        + 2 * 2 * Lp * H * 2                   # x + xT bf16, double-buffered
        + 2 * 2 * H * ebd * 2                  # wq + wkT bf16, double-buffered
        + 4 * Lp * eb * D2 * 4                 # sinQ/cosQ/sinK/cosK f32
        + 6 * Lp * ebd * 4                     # q / kT / qr / kr f32 intermediates
        + 4 * Lp * ebd * 2                     # bf16 copies of qr / kr
        + 6 * Lp * Lp * 4                      # mask / iota / score temporaries
    )


def _pick_e_block(E, D, Lp, H, out_itemsize, budget_bytes):
    """Largest divisor of E whose per-step footprint fits the VMEM budget."""
    for d in sorted((d for d in range(1, E + 1) if E % d == 0), reverse=True):
        if _block_vmem_bytes(d, Lp, H, D, out_itemsize) <= budget_bytes:
            return d
    return 1


def global_pointer_forward(last_hidden_state, attention_mask, dense_w, dense_b,
                           ent_type_size, inner_dim, e_block=None,
                           out_dtype=jnp.bfloat16):
    """Pallas GlobalPointer forward (RoPE=True, test=True path).

    last_hidden_state: (B, L, H) f32
    attention_mask:    (B, L)    f32/int {0,1}
    dense_w:           (H, E*D*2) f32   (transposed vs. torch's (out, in))
    dense_b:           (E*D*2,)   f32
    returns:           (B, E, L, L) out_dtype   (bf16 by default: writeback-bound)
    """
    B, L, H = last_hidden_state.shape
    E, D = ent_type_size, inner_dim
    assert D % 2 == 0
    D2 = D // 2
    scale = 1.0 / (D ** 0.5)
    out_itemsize = jnp.dtype(out_dtype).itemsize

    # Pad seq length to a multiple of 128 for lane-dense output stores / full
    # MXU tiles; the result is sliced back to L below.
    Lp = ((L + 127) // 128) * 128

    # Generation-aware VMEM budget (v7x: 64 MiB/TC, v5e/v6e: 128 MiB).
    vmem_cap = _vmem_capacity_bytes()
    vmem_limit = max(32 * 2 ** 20, int(0.75 * vmem_cap))
    budget = int(0.70 * vmem_cap)

    if e_block is None:
        e_block = _pick_e_block(E, D, Lp, H, out_itemsize, budget)
    assert E % e_block == 0, "e_block must divide ent_type_size"
    n_eb = E // e_block
    EBD2 = e_block * D2
    EBD = e_block * D

    # --- activations (pad + cast + transpose for the key side) --------------
    am = attention_mask.astype(jnp.float32)
    if Lp != L:
        x_f = jnp.pad(last_hidden_state, ((0, 0), (0, Lp - L), (0, 0)))
        am = jnp.pad(am, ((0, 0), (0, Lp - L)))
    else:
        x_f = last_hidden_state
    x_bf = x_f.astype(jnp.bfloat16)                 # (B, Lp, H)
    xt_bf = jnp.swapaxes(x_bf, 1, 2)                # (B, H, Lp)
    am_row = am.reshape(B, 1, Lp)

    # --- parameter re-layout (glue) ------------------------------------------
    wr = dense_w.reshape(H, E, 2 * D)
    br = dense_b.reshape(E, 2 * D)
    # Even-then-odd permutation of the inner dim (applied to both Q and K;
    # leaves q.k invariant, lets the kernel use contiguous rotary halves).
    perm = jnp.concatenate([jnp.arange(0, D, 2), jnp.arange(1, D, 2)])
    wq_p = wr[:, :, :D][:, :, perm] * scale         # (H, E, D)  scale folded into Q
    wk_p = wr[:, :, D:][:, :, perm]                 # (H, E, D)
    bq_p = br[:, :D][:, perm] * scale               # (E, D)
    bk_p = br[:, D:][:, perm]                       # (E, D)

    def q_layout(w):   # (H, E, D) -> (n_eb, H, EB*D), cols [h1 ent-major | h2 ent-major]
        w = w.reshape(H, n_eb, e_block, D)
        h1 = w[..., :D2].transpose(1, 0, 2, 3).reshape(n_eb, H, EBD2)
        h2 = w[..., D2:].transpose(1, 0, 2, 3).reshape(n_eb, H, EBD2)
        return jnp.concatenate([h1, h2], axis=-1)

    def kt_layout(w):  # (H, E, D) -> (n_eb, EB*D, H), rows [h1 ent-major | h2 ent-major]
        w = w.reshape(H, n_eb, e_block, D)
        h1 = w[..., :D2].transpose(1, 2, 3, 0).reshape(n_eb, EBD2, H)
        h2 = w[..., D2:].transpose(1, 2, 3, 0).reshape(n_eb, EBD2, H)
        return jnp.concatenate([h1, h2], axis=1)

    def b_layout(b):   # (E, D) -> (n_eb, EB*D)
        b = b.reshape(n_eb, e_block, D)
        h1 = b[..., :D2].reshape(n_eb, EBD2)
        h2 = b[..., D2:].reshape(n_eb, EBD2)
        return jnp.concatenate([h1, h2], axis=-1)

    wq = q_layout(wq_p).astype(jnp.bfloat16)                      # (n_eb, H, EB*D)
    wkt = kt_layout(wk_p).astype(jnp.bfloat16)                    # (n_eb, EB*D, H)
    bq = b_layout(bq_p).reshape(n_eb, 1, EBD).astype(jnp.float32)
    bkt = b_layout(bk_p).reshape(n_eb, EBD, 1).astype(jnp.float32)

    # --- sinusoidal position embedding (sinusoidal_position_embedding_1) ----
    pos = jnp.arange(Lp, dtype=jnp.float32)[:, None]              # (Lp, 1)
    theta = jnp.power(10000.0, -2.0 * jnp.arange(D2, dtype=jnp.float32) / D)
    ang = pos * theta                                             # (Lp, D2)
    sin = jnp.sin(ang)
    cos = jnp.cos(ang)
    sinq = jnp.tile(sin, (1, e_block))                            # (Lp, EB*D2)
    cosq = jnp.tile(cos, (1, e_block))
    sink = jnp.tile(sin.T, (e_block, 1))                          # (EB*D2, Lp)
    cosk = jnp.tile(cos.T, (e_block, 1))

    # --- grid ordering: minimize redundant HBM re-reads ----------------------
    w_bytes = 2 * H * E * D * 2                   # wq + wkT (bf16), all blocks
    x_bytes = 2 * B * Lp * H * 2                  # x + xT (bf16), all batches
    cost_b_outer = x_bytes + (B if n_eb > 1 else 1) * w_bytes
    cost_e_outer = w_bytes + (n_eb if B > 1 else 1) * x_bytes
    batch_outer = cost_b_outer <= cost_e_outer

    if batch_outer:
        grid = (B, n_eb)
        bsel = lambda i, j: i
        esel = lambda i, j: j
    else:
        grid = (n_eb, B)
        bsel = lambda i, j: j
        esel = lambda i, j: i

    out = pl.pallas_call(
        _global_pointer_kernel,
        out_shape=jax.ShapeDtypeStruct((B, E, Lp, Lp), out_dtype),
        grid=grid,
        in_specs=[
            pl.BlockSpec((1, Lp, H), lambda i, j: (bsel(i, j), 0, 0)),
            pl.BlockSpec((1, H, Lp), lambda i, j: (bsel(i, j), 0, 0)),
            pl.BlockSpec((1, H, EBD), lambda i, j: (esel(i, j), 0, 0)),
            pl.BlockSpec((1, EBD, H), lambda i, j: (esel(i, j), 0, 0)),
            pl.BlockSpec((1, 1, EBD), lambda i, j: (esel(i, j), 0, 0)),
            pl.BlockSpec((1, EBD, 1), lambda i, j: (esel(i, j), 0, 0)),
            pl.BlockSpec((Lp, EBD2), lambda i, j: (0, 0)),
            pl.BlockSpec((Lp, EBD2), lambda i, j: (0, 0)),
            pl.BlockSpec((EBD2, Lp), lambda i, j: (0, 0)),
            pl.BlockSpec((EBD2, Lp), lambda i, j: (0, 0)),
            pl.BlockSpec((1, 1, Lp), lambda i, j: (bsel(i, j), 0, 0)),
        ],
        out_specs=pl.BlockSpec((1, e_block, Lp, Lp),
                               lambda i, j: (bsel(i, j), esel(i, j), 0, 0)),
        compiler_params=pltpu.CompilerParams(
            dimension_semantics=("parallel", "parallel"),
            vmem_limit_bytes=vmem_limit),
    )(x_bf, xt_bf, wq, wkt, bq, bkt, sinq, cosq, sink, cosk, am_row)

    if Lp != L:
        out = out[:, :, :L, :L]
    return out


def _reference_forward(x, am, dense_w, dense_b, E, D):
    """Plain-JAX transcription of the PyTorch forward (RoPE=True, test=True)."""
    B, L, H = x.shape
    out = jnp.einsum('blh,ho->blo', x, dense_w,
                     precision=lax.Precision.HIGHEST) + dense_b          # (B, L, E*2D)
    out = out.reshape(B, L, E, 2 * D)
    qw, kw = out[..., :D], out[..., D:]
    D2 = D // 2
    pos = jnp.arange(L, dtype=jnp.float32)[:, None]
    theta = jnp.power(10000.0, -2.0 * jnp.arange(D2, dtype=jnp.float32) / D)
    ang = pos * theta
    sin = jnp.sin(ang)[None, :, None, :]
    cos = jnp.cos(ang)[None, :, None, :]

    def rot(t):
        t1, t2 = t[..., 0::2], t[..., 1::2]
        return jnp.concatenate([t1 * cos - t2 * sin, t2 * cos + t1 * sin], axis=-1)

    qw, kw = rot(qw), rot(kw)
    logits = jnp.einsum('bmhd,bnhd->bhmn', qw, kw,
                        precision=lax.Precision.HIGHEST)
    pad = am.astype(jnp.float32)[:, None, None, :]
    logits = logits * pad - (1.0 - pad) * BIG_NEG
    tri = jnp.tril(jnp.ones((L, L), jnp.float32), -1)
    logits = logits - tri * BIG_NEG
    return logits / (D ** 0.5)


if __name__ == "__main__":
    B, L, H = 2, 8, 32        # batch, seq, hidden
    E, D = 4, 16              # ent_type_size, inner_dim

    key = jax.random.PRNGKey(0)
    k_x, k_w, k_b = jax.random.split(key, 3)

    last_hidden_state = jax.random.normal(k_x, (B, L, H), dtype=jnp.float32)
    # nn.Linear(H, E*D*2): stored as (H, out) for x @ W.
    dense_w = jax.random.uniform(k_w, (H, E * D * 2), dtype=jnp.float32,
                                 minval=-1.0 / np.sqrt(H), maxval=1.0 / np.sqrt(H))
    dense_b = jax.random.uniform(k_b, (E * D * 2,), dtype=jnp.float32,
                                 minval=-1.0 / np.sqrt(H), maxval=1.0 / np.sqrt(H))
    attention_mask = jnp.array([[1.0] * L, [1.0] * (L - 2) + [0.0] * 2],
                               dtype=jnp.float32)

    ref = _reference_forward(last_hidden_state, attention_mask, dense_w, dense_b, E, D)

    # Default path: bf16 output, auto e_block (largest fitting divisor),
    # auto grid ordering, L padded to 128 inside the wrapper.
    fwd_bf16 = jax.jit(functools.partial(global_pointer_forward,
                                         ent_type_size=E, inner_dim=D))
    out_bf16 = jax.block_until_ready(
        fwd_bf16(last_hidden_state, attention_mask, dense_w, dense_b))
    assert out_bf16.shape == (B, E, L, L)
    np.testing.assert_allclose(np.asarray(out_bf16.astype(jnp.float32)),
                               np.asarray(ref), rtol=5e-2, atol=5e-2)

    # f32 output with e_block=2 -> n_eb=2: exercises the entity-block grid axis.
    fwd_f32 = jax.jit(functools.partial(global_pointer_forward,
                                        ent_type_size=E, inner_dim=D,
                                        e_block=2, out_dtype=jnp.float32))
    out_f32 = jax.block_until_ready(
        fwd_f32(last_hidden_state, attention_mask, dense_w, dense_b))
    np.testing.assert_allclose(np.asarray(out_f32), np.asarray(ref),
                               rtol=3e-2, atol=3e-2)

    print("KERNEL_OK")
</pallas_src>

<mosaic_0001>
module attributes {stable_mosaic.version = 11 : i64} {
  func.func @_global_pointer_kernel(%arg0: i32, %arg1: i32, %arg2: memref<1x128x32xbf16, #tpu.memory_space<vmem>>, %arg3: memref<1x32x128xbf16, #tpu.memory_space<vmem>>, %arg4: memref<1x32x64xbf16, #tpu.memory_space<vmem>>, %arg5: memref<1x64x32xbf16, #tpu.memory_space<vmem>>, %arg6: memref<1x1x64xf32, #tpu.memory_space<vmem>>, %arg7: memref<1x64x1xf32, #tpu.memory_space<vmem>>, %arg8: memref<128x32xf32, #tpu.memory_space<vmem>>, %arg9: memref<128x32xf32, #tpu.memory_space<vmem>>, %arg10: memref<32x128xf32, #tpu.memory_space<vmem>>, %arg11: memref<32x128xf32, #tpu.memory_space<vmem>>, %arg12: memref<1x1x128xf32, #tpu.memory_space<vmem>>, %arg13: memref<1x4x128x128xbf16, #tpu.memory_space<vmem>>) attributes {dimension_semantics = [#tpu.dimension_semantics<parallel>, #tpu.dimension_semantics<parallel>], iteration_bounds = array<i64: 2, 1>, scalar_prefetch = 0 : i64, scratch_operands = 0 : i64, tpu.core_type = #tpu.core_type<tc>, window_params = [{transform_indices = @transform_0, window_bounds = array<i64: 1, 128, 32>}, {transform_indices = @transform_1, window_bounds = array<i64: 1, 32, 128>}, {transform_indices = @transform_2, window_bounds = array<i64: 1, 32, 64>}, {transform_indices = @transform_3, window_bounds = array<i64: 1, 64, 32>}, {transform_indices = @transform_4, window_bounds = array<i64: 1, 1, 64>}, {transform_indices = @transform_5, window_bounds = array<i64: 1, 64, 1>}, {pipeline_mode = #tpu.pipeline_mode<synchronous>, transform_indices = @transform_6, window_bounds = array<i64: 128, 32>}, {pipeline_mode = #tpu.pipeline_mode<synchronous>, transform_indices = @transform_7, window_bounds = array<i64: 128, 32>}, {pipeline_mode = #tpu.pipeline_mode<synchronous>, transform_indices = @transform_8, window_bounds = array<i64: 32, 128>}, {pipeline_mode = #tpu.pipeline_mode<synchronous>, transform_indices = @transform_9, window_bounds = array<i64: 32, 128>}, {transform_indices = @transform_10, window_bounds = array<i64: 1, 1, 128>}, {transform_indices = @transform_11, window_bounds = array<i64: 1, 4, 128, 128>}]} {
    %c0 = arith.constant 0 : index
    %c0_0 = arith.constant 0 : index
    %c0_1 = arith.constant 0 : index
    %0 = vector.load %arg2[%c0, %c0_0, %c0_1] : memref<1x128x32xbf16, #tpu.memory_space<vmem>>, vector<1x128x32xbf16>
    %1 = vector.shape_cast %0 : vector<1x128x32xbf16> to vector<128x32xbf16>
    %c0_2 = arith.constant 0 : index
    %c0_3 = arith.constant 0 : index
    %c0_4 = arith.constant 0 : index
    %2 = vector.load %arg3[%c0_2, %c0_3, %c0_4] : memref<1x32x128xbf16, #tpu.memory_space<vmem>>, vector<1x32x128xbf16>
    %3 = vector.shape_cast %2 : vector<1x32x128xbf16> to vector<32x128xbf16>
    %c0_5 = arith.constant 0 : index
    %c0_6 = arith.constant 0 : index
    %c0_7 = arith.constant 0 : index
    %4 = vector.load %arg4[%c0_5, %c0_6, %c0_7] : memref<1x32x64xbf16, #tpu.memory_space<vmem>>, vector<1x32x64xbf16>
    %5 = vector.shape_cast %4 : vector<1x32x64xbf16> to vector<32x64xbf16>
    %cst = arith.constant dense<0.000000e+00> : vector<128x64xf32>
    %6 = tpu.matmul %1, %5, %cst {dimension_numbers = #tpu.dot_dimension_numbers<[1], [0], [0], [1], [0, 0, 1, 1], [], []>} : vector<128x32xbf16>, vector<32x64xbf16>, vector<128x64xf32> -> vector<128x64xf32>
    %c0_8 = arith.constant 0 : index
    %c0_9 = arith.constant 0 : index
    %c0_10 = arith.constant 0 : index
    %7 = vector.load %arg6[%c0_8, %c0_9, %c0_10] : memref<1x1x64xf32, #tpu.memory_space<vmem>>, vector<1x1x64xf32>
    %8 = vector.shape_cast %7 : vector<1x1x64xf32> to vector<1x64xf32>
    %9 = vector.broadcast %8 : vector<1x64xf32> to vector<128x64xf32>
    %10 = arith.addf %6, %9 : vector<128x64xf32>
    %c0_11 = arith.constant 0 : index
    %c0_12 = arith.constant 0 : index
    %c0_13 = arith.constant 0 : index
    %11 = vector.load %arg5[%c0_11, %c0_12, %c0_13] : memref<1x64x32xbf16, #tpu.memory_space<vmem>>, vector<1x64x32xbf16>
    %12 = vector.shape_cast %11 : vector<1x64x32xbf16> to vector<64x32xbf16>
    %cst_14 = arith.constant dense<0.000000e+00> : vector<64x128xf32>
    %13 = tpu.matmul %12, %3, %cst_14 {dimension_numbers = #tpu.dot_dimension_numbers<[1], [0], [0], [1], [0, 0, 1, 1], [], []>} : vector<64x32xbf16>, vector<32x128xbf16>, vector<64x128xf32> -> vector<64x128xf32>
    %c0_15 = arith.constant 0 : index
    %c0_16 = arith.constant 0 : index
    %c0_17 = arith.constant 0 : index
    %14 = vector.load %arg7[%c0_15, %c0_16, %c0_17] : memref<1x64x1xf32, #tpu.memory_space<vmem>>, vector<1x64x1xf32>
    %15 = vector.shape_cast %14 : vector<1x64x1xf32> to vector<64x1xf32>
    %16 = vector.broadcast %15 : vector<64x1xf32> to vector<64x128xf32>
    %17 = arith.addf %13, %16 : vector<64x128xf32>
    %c0_18 = arith.constant 0 : index
    %c0_19 = arith.constant 0 : index
    %18 = vector.load %arg8[%c0_18, %c0_19] : memref<128x32xf32, #tpu.memory_space<vmem>>, vector<128x32xf32>
    %c0_20 = arith.constant 0 : index
    %c0_21 = arith.constant 0 : index
    %19 = vector.load %arg9[%c0_20, %c0_21] : memref<128x32xf32, #tpu.memory_space<vmem>>, vector<128x32xf32>
    %c0_22 = arith.constant 0 : index
    %c0_23 = arith.constant 0 : index
    %20 = vector.load %arg10[%c0_22, %c0_23] : memref<32x128xf32, #tpu.memory_space<vmem>>, vector<32x128xf32>
    %c0_24 = arith.constant 0 : index
    %c0_25 = arith.constant 0 : index
    %21 = vector.load %arg11[%c0_24, %c0_25] : memref<32x128xf32, #tpu.memory_space<vmem>>, vector<32x128xf32>
    %c0_26 = arith.constant 0 : index
    %c0_27 = arith.constant 0 : index
    %c0_28 = arith.constant 0 : index
    %22 = vector.load %arg12[%c0_26, %c0_27, %c0_28] : memref<1x1x128xf32, #tpu.memory_space<vmem>>, vector<1x1x128xf32>
    %23 = vector.shape_cast %22 : vector<1x1x128xf32> to vector<1x128xf32>
    %24 = vector.extract_strided_slice %10 {offsets = [0, 0], sizes = [128, 32], strides = [1, 1]} : vector<128x64xf32> to vector<128x32xf32>
    %25 = vector.extract_strided_slice %10 {offsets = [0, 32], sizes = [128, 32], strides = [1, 1]} : vector<128x64xf32> to vector<128x32xf32>
    %26 = vector.extract_strided_slice %17 {offsets = [0, 0], sizes = [32, 128], strides = [1, 1]} : vector<64x128xf32> to vector<32x128xf32>
    %27 = vector.extract_strided_slice %17 {offsets = [32, 0], sizes = [32, 128], strides = [1, 1]} : vector<64x128xf32> to vector<32x128xf32>
    %28 = arith.mulf %24, %19 : vector<128x32xf32>
    %29 = arith.mulf %25, %18 : vector<128x32xf32>
    %30 = arith.subf %28, %29 : vector<128x32xf32>
    %31 = arith.mulf %25, %19 : vector<128x32xf32>
    %32 = arith.mulf %24, %18 : vector<128x32xf32>
    %33 = arith.addf %31, %32 : vector<128x32xf32>
    %34 = arith.mulf %26, %21 : vector<32x128xf32>
    %35 = arith.mulf %27, %20 : vector<32x128xf32>
    %36 = arith.subf %34, %35 : vector<32x128xf32>
    %37 = vector.broadcast %23 : vector<1x128xf32> to vector<32x128xf32>
    %38 = arith.mulf %36, %37 : vector<32x128xf32>
    %39 = arith.mulf %27, %21 : vector<32x128xf32>
    %40 = arith.mulf %26, %20 : vector<32x128xf32>
    %41 = arith.addf %39, %40 : vector<32x128xf32>
    %42 = vector.broadcast %23 : vector<1x128xf32> to vector<32x128xf32>
    %43 = arith.mulf %41, %42 : vector<32x128xf32>
    %44 = arith.truncf %30 : vector<128x32xf32> to vector<128x32xbf16>
    %45 = arith.truncf %33 : vector<128x32xf32> to vector<128x32xbf16>
    %46 = arith.truncf %38 : vector<32x128xf32> to vector<32x128xbf16>
    %47 = arith.truncf %43 : vector<32x128xf32> to vector<32x128xbf16>
    %48 = tpu.iota {dimensions = array<i32: 0>} : vector<128x128xi32>
    %49 = tpu.iota {dimensions = array<i32: 1>} : vector<128x128xi32>
    %50 = arith.cmpi sgt, %48, %49 : vector<128x128xi32>
    %51 = arith.extui %50 : vector<128x128xi1> to vector<128x128xi32>
    %52 = arith.sitofp %51 : vector<128x128xi32> to vector<128x128xf32>
    %cst_29 = arith.constant 1.000000e+00 : f32
    %53 = vector.broadcast %cst_29 : f32 to vector<1x128xf32>
    %54 = arith.subf %53, %23 : vector<1x128xf32>
    %55 = vector.broadcast %54 : vector<1x128xf32> to vector<128x128xf32>
    %56 = arith.addf %55, %52 : vector<128x128xf32>
    %cst_30 = arith.constant 2.500000e+11 : f32
    %57 = vector.broadcast %cst_30 : f32 to vector<128x128xf32>
    %58 = arith.mulf %56, %57 : vector<128x128xf32>
    %59 = vector.extract_strided_slice %44 {offsets = [0, 0], sizes = [128, 8], strides = [1, 1]} : vector<128x32xbf16> to vector<128x8xbf16>
    %60 = vector.extract_strided_slice %46 {offsets = [0, 0], sizes = [8, 128], strides = [1, 1]} : vector<32x128xbf16> to vector<8x128xbf16>
    %cst_31 = arith.constant dense<0.000000e+00> : vector<128x128xf32>
    %61 = tpu.matmul %59, %60, %cst_31 {dimension_numbers = #tpu.dot_dimension_numbers<[1], [0], [0], [1], [0, 0, 1, 1], [], []>} : vector<128x8xbf16>, vector<8x128xbf16>, vector<128x128xf32> -> vector<128x128xf32>
    %62 = vector.extract_strided_slice %45 {offsets = [0, 0], sizes = [128, 8], strides = [1, 1]} : vector<128x32xbf16> to vector<128x8xbf16>
    %63 = vector.extract_strided_slice %47 {offsets = [0, 0], sizes = [8, 128], strides = [1, 1]} : vector<32x128xbf16> to vector<8x128xbf16>
    %cst_32 = arith.constant dense<0.000000e+00> : vector<128x128xf32>
    %64 = tpu.matmul %62, %63, %cst_32 {dimension_numbers = #tpu.dot_dimension_numbers<[1], [0], [0], [1], [0, 0, 1, 1], [], []>} : vector<128x8xbf16>, vector<8x128xbf16>, vector<128x128xf32> -> vector<128x128xf32>
    %65 = arith.addf %61, %64 : vector<128x128xf32>
    %66 = arith.subf %65, %58 : vector<128x128xf32>
    %67 = arith.truncf %66 : vector<128x128xf32> to vector<128x128xbf16>
    %c0_33 = arith.constant 0 : index
    %c0_34 = arith.constant 0 : index
    %c0_35 = arith.constant 0 : index
    %c0_36 = arith.constant 0 : index
    %68 = vector.load %arg13[%c0_33, %c0_34, %c0_35, %c0_36] : memref<1x4x128x128xbf16, #tpu.memory_space<vmem>>, vector<1x1x128x128xbf16>
    %69 = vector.shape_cast %68 : vector<1x1x128x128xbf16> to vector<128x128xbf16>
    %70 = vector.shape_cast %67 : vector<128x128xbf16> to vector<1x1x128x128xbf16>
    tpu.vector_store %arg13[%c0_33, %c0_34, %c0_35, %c0_36], %70 {strides = array<i32>} : memref<1x4x128x128xbf16, #tpu.memory_space<vmem>>, vector<1x1x128x128xbf16>,
    %71 = vector.extract_strided_slice %44 {offsets = [0, 8], sizes = [128, 8], strides = [1, 1]} : vector<128x32xbf16> to vector<128x8xbf16>
    %72 = vector.extract_strided_slice %46 {offsets = [8, 0], sizes = [8, 128], strides = [1, 1]} : vector<32x128xbf16> to vector<8x128xbf16>
    %cst_37 = arith.constant dense<0.000000e+00> : vector<128x128xf32>
    %73 = tpu.matmul %71, %72, %cst_37 {dimension_numbers = #tpu.dot_dimension_numbers<[1], [0], [0], [1], [0, 0, 1, 1], [], []>} : vector<128x8xbf16>, vector<8x128xbf16>, vector<128x128xf32> -> vector<128x128xf32>
    %74 = vector.extract_strided_slice %45 {offsets = [0, 8], sizes = [128, 8], strides = [1, 1]} : vector<128x32xbf16> to vector<128x8xbf16>
    %75 = vector.extract_strided_slice %47 {offsets = [8, 0], sizes = [8, 128], strides = [1, 1]} : vector<32x128xbf16> to vector<8x128xbf16>
    %cst_38 = arith.constant dense<0.000000e+00> : vector<128x128xf32>
    %76 = tpu.matmul %74, %75, %cst_38 {dimension_numbers = #tpu.dot_dimension_numbers<[1], [0], [0], [1], [0, 0, 1, 1], [], []>} : vector<128x8xbf16>, vector<8x128xbf16>, vector<128x128xf32> -> vector<128x128xf32>
    %77 = arith.addf %73, %76 : vector<128x128xf32>
    %78 = arith.subf %77, %58 : vector<128x128xf32>
    %79 = arith.truncf %78 : vector<128x128xf32> to vector<128x128xbf16>
    %c0_39 = arith.constant 0 : index
    %c1 = arith.constant 1 : index
    %c0_40 = arith.constant 0 : index
    %c0_41 = arith.constant 0 : index
    %80 = vector.load %arg13[%c0_39, %c1, %c0_40, %c0_41] : memref<1x4x128x128xbf16, #tpu.memory_space<vmem>>, vector<1x1x128x128xbf16>
    %81 = vector.shape_cast %80 : vector<1x1x128x128xbf16> to vector<128x128xbf16>
    %82 = vector.shape_cast %79 : vector<128x128xbf16> to vector<1x1x128x128xbf16>
    tpu.vector_store %arg13[%c0_39, %c1, %c0_40, %c0_41], %82 {strides = array<i32>} : memref<1x4x128x128xbf16, #tpu.memory_space<vmem>>, vector<1x1x128x128xbf16>,
    %83 = vector.extract_strided_slice %44 {offsets = [0, 16], sizes = [128, 8], strides = [1, 1]} : vector<128x32xbf16> to vector<128x8xbf16>
    %84 = vector.extract_strided_slice %46 {offsets = [16, 0], sizes = [8, 128], strides = [1, 1]} : vector<32x128xbf16> to vector<8x128xbf16>
    %cst_42 = arith.constant dense<0.000000e+00> : vector<128x128xf32>
    %85 = tpu.matmul %83, %84, %cst_42 {dimension_numbers = #tpu.dot_dimension_numbers<[1], [0], [0], [1], [0, 0, 1, 1], [], []>} : vector<128x8xbf16>, vector<8x128xbf16>, vector<128x128xf32> -> vector<128x128xf32>
    %86 = vector.extract_strided_slice %45 {offsets = [0, 16], sizes = [128, 8], strides = [1, 1]} : vector<128x32xbf16> to vector<128x8xbf16>
    %87 = vector.extract_strided_slice %47 {offsets = [16, 0], sizes = [8, 128], strides = [1, 1]} : vector<32x128xbf16> to vector<8x128xbf16>
    %cst_43 = arith.constant dense<0.000000e+00> : vector<128x128xf32>
    %88 = tpu.matmul %86, %87, %cst_43 {dimension_numbers = #tpu.dot_dimension_numbers<[1], [0], [0], [1], [0, 0, 1, 1], [], []>} : vector<128x8xbf16>, vector<8x128xbf16>, vector<128x128xf32> -> vector<128x128xf32>
    %89 = arith.addf %85, %88 : vector<128x128xf32>
    %90 = arith.subf %89, %58 : vector<128x128xf32>
    %91 = arith.truncf %90 : vector<128x128xf32> to vector<128x128xbf16>
    %c0_44 = arith.constant 0 : index
    %c2 = arith.constant 2 : index
    %c0_45 = arith.constant 0 : index
    %c0_46 = arith.constant 0 : index
    %92 = vector.load %arg13[%c0_44, %c2, %c0_45, %c0_46] : memref<1x4x128x128xbf16, #tpu.memory_space<vmem>>, vector<1x1x128x128xbf16>
    %93 = vector.shape_cast %92 : vector<1x1x128x128xbf16> to vector<128x128xbf16>
    %94 = vector.shape_cast %91 : vector<128x128xbf16> to vector<1x1x128x128xbf16>
    tpu.vector_store %arg13[%c0_44, %c2, %c0_45, %c0_46], %94 {strides = array<i32>} : memref<1x4x128x128xbf16, #tpu.memory_space<vmem>>, vector<1x1x128x128xbf16>,
    %95 = vector.extract_strided_slice %44 {offsets = [0, 24], sizes = [128, 8], strides = [1, 1]} : vector<128x32xbf16> to vector<128x8xbf16>
    %96 = vector.extract_strided_slice %46 {offsets = [24, 0], sizes = [8, 128], strides = [1, 1]} : vector<32x128xbf16> to vector<8x128xbf16>
    %cst_47 = arith.constant dense<0.000000e+00> : vector<128x128xf32>
    %97 = tpu.matmul %95, %96, %cst_47 {dimension_numbers = #tpu.dot_dimension_numbers<[1], [0], [0], [1], [0, 0, 1, 1], [], []>} : vector<128x8xbf16>, vector<8x128xbf16>, vector<128x128xf32> -> vector<128x128xf32>
    %98 = vector.extract_strided_slice %45 {offsets = [0, 24], sizes = [128, 8], strides = [1, 1]} : vector<128x32xbf16> to vector<128x8xbf16>
    %99 = vector.extract_strided_slice %47 {offsets = [24, 0], sizes = [8, 128], strides = [1, 1]} : vector<32x128xbf16> to vector<8x128xbf16>
    %cst_48 = arith.constant dense<0.000000e+00> : vector<128x128xf32>
    %100 = tpu.matmul %98, %99, %cst_48 {dimension_numbers = #tpu.dot_dimension_numbers<[1], [0], [0], [1], [0, 0, 1, 1], [], []>} : vector<128x8xbf16>, vector<8x128xbf16>, vector<128x128xf32> -> vector<128x128xf32>
    %101 = arith.addf %97, %100 : vector<128x128xf32>
    %102 = arith.subf %101, %58 : vector<128x128xf32>
    %103 = arith.truncf %102 : vector<128x128xf32> to vector<128x128xbf16>
    %c0_49 = arith.constant 0 : index
    %c3 = arith.constant 3 : index
    %c0_50 = arith.constant 0 : index
    %c0_51 = arith.constant 0 : index
    %104 = vector.load %arg13[%c0_49, %c3, %c0_50, %c0_51] : memref<1x4x128x128xbf16, #tpu.memory_space<vmem>>, vector<1x1x128x128xbf16>
    %105 = vector.shape_cast %104 : vector<1x1x128x128xbf16> to vector<128x128xbf16>
    %106 = vector.shape_cast %103 : vector<128x128xbf16> to vector<1x1x128x128xbf16>
    tpu.vector_store %arg13[%c0_49, %c3, %c0_50, %c0_51], %106 {strides = array<i32>} : memref<1x4x128x128xbf16, #tpu.memory_space<vmem>>, vector<1x1x128x128xbf16>,
    return
  }
  func.func @transform_0(%arg0: i32, %arg1: i32) -> (i32, i32, i32) {
    %c0_i32 = arith.constant 0 : i32
    %c0_i32_0 = arith.constant 0 : i32
    %c0_i32_1 = arith.constant 0 : i32
    return %arg0, %c0_i32, %c0_i32_0 : i32, i32, i32
  }
  func.func @transform_1(%arg0: i32, %arg1: i32) -> (i32, i32, i32) {
    %c0_i32 = arith.constant 0 : i32
    %c0_i32_0 = arith.constant 0 : i32
    %c0_i32_1 = arith.constant 0 : i32
    return %arg0, %c0_i32, %c0_i32_0 : i32, i32, i32
  }
  func.func @transform_2(%arg0: i32, %arg1: i32) -> (i32, i32, i32) {
    %c0_i32 = arith.constant 0 : i32
    %c0_i32_0 = arith.constant 0 : i32
    %c0_i32_1 = arith.constant 0 : i32
    return %arg1, %c0_i32, %c0_i32_0 : i32, i32, i32
  }
  func.func @transform_3(%arg0: i32, %arg1: i32) -> (i32, i32, i32) {
    %c0_i32 = arith.constant 0 : i32
    %c0_i32_0 = arith.constant 0 : i32
    %c0_i32_1 = arith.constant 0 : i32
    return %arg1, %c0_i32, %c0_i32_0 : i32, i32, i32
  }
  func.func @transform_4(%arg0: i32, %arg1: i32) -> (i32, i32, i32) {
    %c0_i32 = arith.constant 0 : i32
    %c0_i32_0 = arith.constant 0 : i32
    %c0_i32_1 = arith.constant 0 : i32
    return %arg1, %c0_i32, %c0_i32_0 : i32, i32, i32
  }
  func.func @transform_5(%arg0: i32, %arg1: i32) -> (i32, i32, i32) {
    %c0_i32 = arith.constant 0 : i32
    %c0_i32_0 = arith.constant 0 : i32
    %c0_i32_1 = arith.constant 0 : i32
    return %arg1, %c0_i32, %c0_i32_0 : i32, i32, i32
  }
  func.func @transform_6(%arg0: i32, %arg1: i32) -> (i32, i32) {
    %c0_i32 = arith.constant 0 : i32
    %c0_i32_0 = arith.constant 0 : i32
    %c0_i32_1 = arith.constant 0 : i32
    return %c0_i32, %c0_i32_0 : i32, i32
  }
  func.func @transform_7(%arg0: i32, %arg1: i32) -> (i32, i32) {
    %c0_i32 = arith.constant 0 : i32
    %c0_i32_0 = arith.constant 0 : i32
    %c0_i32_1 = arith.constant 0 : i32
    return %c0_i32, %c0_i32_0 : i32, i32
  }
  func.func @transform_8(%arg0: i32, %arg1: i32) -> (i32, i32) {
    %c0_i32 = arith.constant 0 : i32
    %c0_i32_0 = arith.constant 0 : i32
    %c0_i32_1 = arith.constant 0 : i32
    return %c0_i32, %c0_i32_0 : i32, i32
  }
  func.func @transform_9(%arg0: i32, %arg1: i32) -> (i32, i32) {
    %c0_i32 = arith.constant 0 : i32
    %c0_i32_0 = arith.constant 0 : i32
    %c0_i32_1 = arith.constant 0 : i32
    return %c0_i32, %c0_i32_0 : i32, i32
  }
  func.func @transform_10(%arg0: i32, %arg1: i32) -> (i32, i32, i32) {
    %c0_i32 = arith.constant 0 : i32
    %c0_i32_0 = arith.constant 0 : i32
    %c0_i32_1 = arith.constant 0 : i32
    return %arg0, %c0_i32, %c0_i32_0 : i32, i32, i32
  }
  func.func @transform_11(%arg0: i32, %arg1: i32) -> (i32, i32, i32, i32) {
    %c0_i32 = arith.constant 0 : i32
    %c0_i32_0 = arith.constant 0 : i32
    %c0_i32_1 = arith.constant 0 : i32
    return %arg0, %arg1, %c0_i32, %c0_i32_0 : i32, i32, i32, i32
  }
}

</mosaic_0001>

<bundles_post_ra>
// kernel: global_pointer_forward.1
= control target key start
LH: loop header
LB: loop body
LE: loop exit
PB: predicated region body
PF: predicated region fallthrough
CT: control target
= control target key end

     0   :  { %s6142_s0 = inlined_call_operand.hbm [shape: bf16[2,128,32], index: 0, kind: input, shape index: {}]   ;;  %s6143_s1 = inlined_call_operand.hbm [shape: bf16[2,32,128], index: 1, kind: input, shape index: {}]   ;;  %s6144_s2 = inlined_call_operand.hbm [shape: bf16[1,32,64], index: 2, kind: input, shape index: {}]   ;;  %s6145_s3 = inlined_call_operand.hbm [shape: bf16[1,64,32], index: 3, kind: input, shape index: {}]   ;;  %s6146_s4 = inlined_call_operand.hbm [shape: f32[1,1,64], index: 4, kind: input, shape index: {}]   ;;  %s6147_s5 = inlined_call_operand.hbm [shape: f32[1,64,1], index: 5, kind: input, shape index: {}]   ;;  %s6148_s6 = inlined_call_operand.hbm [shape: f32[128,32], index: 6, kind: input, shape index: {}]   ;;  %s6149_s7 = inlined_call_operand.hbm [shape: f32[128,32], index: 7, kind: input, shape index: {}]   ;;  %s6150_s8 = inlined_call_operand.hbm [shape: f32[32,128], index: 8, kind: input, shape index: {}]   ;;  %s6151_s9 = inlined_call_operand.hbm [shape: f32[32,128], index: 9, kind: input, shape index: {}]   ;;  %s6152_s10 = inlined_call_operand.hbm [shape: f32[2,1,128], index: 10, kind: input, shape index: {}]   ;;  %s6153_s11 = inlined_call_operand.hbm [shape: bf16[2,4,128,128], index: 11, kind: output, shape index: {}]  }
   0x1   :  { %6191 = sst [smem:[#allocation48_spill]] %s6142_s0 }
   0x2   :  { %6192 = sst [smem:[#allocation49_spill]] %s6143_s1 }
   0x3   :  { %6193 = sst [smem:[#allocation50_spill]] %s6144_s2 }
   0x4   :  { %6194 = sst [smem:[#allocation51_spill]] %s6145_s3 }
   0x5   :  { %6195 = sst [smem:[#allocation52_spill]] %s6146_s4 }
   0x6   :  { %6196 = sst [smem:[#allocation53_spill]] %s6147_s5 }
   0x7   :  { %6197 = sst [smem:[#allocation54_spill]] %s6149_s7 }
   0x8   :  { %6198 = sst [smem:[#allocation55_spill]] %s6152_s10 }
   0x9   :  { %6199 = sst [smem:[#allocation56_spill]] %s6153_s11 }
   0xa   :  { %16 = vsyncpa [#allocation3], 0 }
   0xb   :  { %18 = vsyncpa [#allocation3 + $0x1], 0 }
   0xc   :  { %19 = vsyncpa [#allocation6], 0 }
   0xd   :  { %21 = vsyncpa [#allocation6 + $0x1], 0 }
   0xe   :  { %22 = vsyncpa [#allocation9], 0 }
   0xf   :  { %23 = vsyncpa [#allocation12], 0 }
  0x10   :  { %24 = vsyncpa [#allocation15], 0 }
  0x11   :  { %25 = vsyncpa [#allocation18], 0 }
  0x12   :  { %26 = vsyncpa [#allocation4], 0 }
  0x13   :  { %28 = vsyncpa [#allocation4 + $0x1], 0  ;;  %s4862_s17 = smov 0   ;;  %s4864_s18 = smov 0  }
  0x14   :  { %s4866_s19 = smov 0   ;;  %s4868_s20 = smov 0  }
  0x15   :  { %s4870_s21 = smov 0   ;;  %s4872_s22 = smov 0  }
  0x16 LB: > { %6200 = sst [smem:[#allocation30_spill]] %s4752_s17  ;;  %s4893_s23 = sadd.s32 4294967295, %s4772_s22   ;;  %s4772_s22 = sphi %s4872_s22, %s34_s22   ;;  %s4768_s21 = sphi %s4870_s21, %s6286_s21   ;;  %s4764_s20 = sphi %s4868_s20, %s6285_s20   ;;  %s4760_s19 = sphi %s4866_s19, %s6281_s19   ;;  %s4756_s18 = sphi %s4864_s18, %s6284_s18   ;;  %s4752_s17 = sphi %s4862_s17, %s6283_s17  }
  0x17   : > { %6201 = sst [smem:[#allocation31_spill]] %s4760_s19  ;;  %p3308_p0 = scmp.ge.s32.totalorder %s4772_s22, 1 }
  0x18   : > { %6202 = sst [smem:[#allocation32_spill]] %s4764_s20  ;;  %p6158_p1 = scmp.eq.s32.totalorder %s4893_s23, 0 }
  0x19   : > { %p345_p2 = scmp.lt.s32.totalorder %s4772_s22, 3  ;;  %s4774_s25 = smov [#allocation7]  }
  0x1a   : > { %s360_s26 = sshll.u32 %s4774_s25, 4  ;;  %s4775_s28 = smov [#allocation8]   ;;  %s4902_s26 = int_to_ptr.vmem [resolvable:$true] %s360_s26 }
  0x1b   : > { %p4898_p3 = pnand %p3308_p0, %p345_p2  ;;  %s376_s29 = sshll.u32 %s4775_s28, 4  ;;  %s4913_s29 = int_to_ptr.vmem [resolvable:$true] %s376_s29 }
  0x1c   : > { %s4776_s30 = smov [#allocation11]   ;;  %s6206_s2 = sld [smem:[#allocation50_spill]] }
  0x1d   : > { %s6203_s24 = scalar_select %p4898_p3, 1, 0 }
  0x1e   : > { %p4201_p4 = pneg %p4898_p3  ;;  %s4915_s12 = sshll.u32 %s4776_s30, 4  ;;  %s406_s12 = int_to_ptr.vmem [resolvable:$true] %s4915_s12 }
  0x1f   : > { %6204 = sst [smem:[#allocation33_spill]] %s6203_s24 }
  0x20   : > { %p4909_p6 = pnand %p4201_p4, %p6158_p1 }
  0x22   : > { %s6205_s27 = scalar_select %p4909_p6, 1, 0 }
  0x23   : > { %s4348_s15 = scalar_lea.hbm %s6206_s2, 256  ;;  %p4925_p8 = pneg %p4909_p6 }
  0x24   : > { %p4349_p7 = scmp.ne.s32.totalorder %s6206_s2, %s4348_s15  ;;  %p4355_p11 = scmp.lt.u32.totalorder %s4348_s15, %s6206_s2 }
  0x25   : > { %s6207_s11 = scalar_select %p4925_p8, 1, 0 }
  0x26   : > { %p4351_p9 = pnand %p4925_p8, %p4349_p7 }
  0x28   : > { %p4352_p10 = pneg %p4351_p9 }
  0x2a   : > { %p4357_p12 = pnand %p4355_p11, %p4352_p10 }
  0x2c   : > { %4360 = shalt.err (!%p4357_p12)
}
  0x2d   : > { %s4361_s13 = scalar_lea.vmem %s4902_s26, 256  ;;  %p4369_p4 = scmp.lt.s32.totalorder %s4902_s26, %s4902_s26 }
  0x2e   : > { %p4362_p13 = scmp.ne.s32.totalorder %s4902_s26, %s4361_s13  ;;  %p4370_p5 = scmp.lt.s32.totalorder %s4361_s13, %s4361_s13 }
  0x30   : > { %p4364_p0 = pnand %p4362_p13, %p4925_p8  ;;  %p4371_p7 = por %p4370_p5, %p4369_p4 }
  0x32   : > { %p4365_p2 = pneg %p4364_p0 }
  0x34   : > { %p4372_p9 = pnand %p4371_p7, %p4365_p2 }
  0x36   : > { %4375 = shalt.err (!%p4372_p9)
}
  0x37   : > { %s6160_s14 = smov 64   ;;  %s6162_s15 = smov 4  }
  0x38   : > { %4204 = dma.hbm_to_vmem [thread:$0]  (!%p4909_p6), %s6206_s2, 256, %s4902_s26, [#allocation6], %s6160_s14, %s6160_s14, %s6162_s15  }
  0x39   : > { %s6208_s3 = sld [smem:[#allocation51_spill]] }
  0x3f   : > { %s4376_s13 = scalar_lea.hbm %s6208_s3, 512 }
  0x40   : > { %p4377_p5 = scmp.ne.s32.totalorder %s6208_s3, %s4376_s13  ;;  %p4383_p12 = scmp.lt.u32.totalorder %s4376_s13, %s6208_s3 }
  0x42   : > { %p4379_p10 = pnand %p4377_p5, %p4925_p8 }
  0x44   : > { %p4380_p11 = pneg %p4379_p10 }
  0x46   : > { %p4385_p13 = pnand %p4383_p12, %p4380_p11 }
  0x48   : > { %4388 = shalt.err (!%p4385_p13)
}
  0x49   : > { %s4389_s26 = scalar_lea.vmem %s4913_s29, 512  ;;  %p4397_p7 = scmp.lt.s32.totalorder %s4913_s29, %s4913_s29 }
  0x4a   : > { %p4390_p0 = scmp.ne.s32.totalorder %s4913_s29, %s4389_s26  ;;  %p4398_p9 = scmp.lt.s32.totalorder %s4389_s26, %s4389_s26 }
  0x4c   : > { %p4392_p2 = pnand %p4390_p0, %p4925_p8  ;;  %p4399_p5 = por %p4398_p9, %p4397_p7 }
  0x4e   : > { %p4393_p4 = pneg %p4392_p2 }
  0x50   : > { %p4400_p10 = pnand %p4399_p5, %p4393_p4 }
  0x52   : > { %4403 = shalt.err (!%p4400_p10)
}
  0x53   : > { %4207 = dma.hbm_to_vmem [thread:$0]  (!%p4909_p6), %s6208_s3, 512, %s4913_s29, [#allocation9], %s6160_s14, %s6160_s14, %s6162_s15  }
  0x54   : > { %s6209_s5 = sld [smem:[#allocation53_spill]] }
  0x5a   : > { %s4404_s16 = scalar_lea.hbm %s6209_s5, 1024 }
  0x5b   : > { %p4405_p11 = scmp.ne.s32.totalorder %s6209_s5, %s4404_s16  ;;  %p4411_p0 = scmp.lt.u32.totalorder %s4404_s16, %s6209_s5 }
  0x5d   : > { %p4407_p12 = pnand %p4405_p11, %p4925_p8 }
  0x5f   : > { %p4408_p13 = pneg %p4407_p12 }
  0x61   : > { %p4413_p2 = pnand %p4411_p0, %p4408_p13 }
  0x63   : > { %4416 = shalt.err (!%p4413_p2)
}
  0x64   : > { %s4417_s26 = scalar_lea.vmem %s406_s12, 1024  ;;  %p4425_p5 = scmp.lt.s32.totalorder %s406_s12, %s406_s12 }
  0x65   : > { %p4418_p4 = scmp.ne.s32.totalorder %s406_s12, %s4417_s26  ;;  %p4426_p10 = scmp.lt.s32.totalorder %s4417_s26, %s4417_s26 }
  0x67   : > { %p4420_p7 = pnand %p4418_p4, %p4925_p8  ;;  %p4427_p1 = por %p4426_p10, %p4425_p5 }
  0x69   : > { %p4421_p9 = pneg %p4420_p7 }
  0x6b   : > { %p4428_p3 = pnand %p4427_p1, %p4421_p9 }
  0x6d   : > { %4431 = shalt.err (!%p4428_p3)
}
  0x6e   : > { %s6164_s29 = smov 128   ;;  %s6166_s1 = smov 8  }
  0x6f   : > { %4213 = dma.hbm_to_vmem [thread:$0]  (!%p4909_p6), %s6209_s5, 1024, %s406_s12, [#allocation12], %s6164_s29, %s6164_s29, %s6166_s1  }
  0x70   : > { %s4781_s24 = smov [#allocation14]   ;;  %s6210_s7 = sld [smem:[#allocation54_spill]] }
  0x71   : > { %s431_s16 = sshll.u32 %s4781_s24, 4  ;;  %s432_s16 = int_to_ptr.vmem [resolvable:$true] %s431_s16 }
  0x76   : > { %s4432_s30 = scalar_lea.hbm %s6210_s7, 2048 }
  0x77   : > { %p4433_p1 = scmp.ne.s32.totalorder %s6210_s7, %s4432_s30  ;;  %p4439_p12 = scmp.lt.u32.totalorder %s4432_s30, %s6210_s7 }
  0x79   : > { %p4435_p3 = pnand %p4433_p1, %p4925_p8 }
  0x7b   : > { %p4436_p11 = pneg %p4435_p3 }
  0x7d   : > { %p4441_p13 = pnand %p4439_p12, %p4436_p11 }
  0x7f   : > { %4444 = shalt.err (!%p4441_p13)
}
  0x80   : > { %s4445_s12 = scalar_lea.vmem %s432_s16, 2048  ;;  %p4453_p7 = scmp.lt.s32.totalorder %s432_s16, %s432_s16 }
  0x81   : > { %p4446_p0 = scmp.ne.s32.totalorder %s432_s16, %s4445_s12  ;;  %p4454_p9 = scmp.lt.s32.totalorder %s4445_s12, %s4445_s12 }
  0x83   : > { %p4448_p2 = pnand %p4446_p0, %p4925_p8  ;;  %p4455_p5 = por %p4454_p9, %p4453_p7 }
  0x85   : > { %p4449_p4 = pneg %p4448_p2 }
  0x87   : > { %p4456_p10 = pnand %p4455_p5, %p4449_p4 }
  0x89   : > { %4459 = shalt.err (!%p4456_p10)
}
  0x8a   : > { %4219 = dma.hbm_to_vmem [thread:$0]  (!%p4909_p6), %s6210_s7, 2048, %s432_s16, [#allocation15], %s6164_s29, %s6164_s29, %s6166_s1  }
  0x8b   : > { %s3307_s10 = sadd.s32 4294967294, %s4772_s22   ;;  %s46_s20 = sadd.s32 1, %s4768_s21 }
  0x8c   : > { %p48_p1 = scmp.ge.s32.totalorder %s46_s20, 2  ;;  %s53_s24 = sadd.s32 1, %s4760_s19 }
  0x8d   : > { %p60_p3 = scmp.ne.s32.totalorder %s4760_s19, %s4756_s18  ;;  %p61_p11 = scmp.eq.s32.totalorder %s4772_s22, 0 }
  0x8e   : > { %s6288_s20 = smov (%p48_p1, %s46_s20), 0  ;;  %p66_p13 = scmp.ne.s32.totalorder %s4756_s18, %s4752_s17 }
  0x8f   : > { %6211 = sst [smem:[#allocation34_spill]] %s6288_s20  ;;  %p5026_p12 = por %p61_p11, %p60_p3 }
  0x90   : > { %s50_s16 = ssub.s32 %s4768_s21, %s6288_s20  ;;  %p332_p0 = scmp.eq.s32.totalorder %s4893_s23, 1 }
  0x91   : > { %p51_p2 = scmp.eq.s32.totalorder %s50_s16, 0  ;;  %p6213_p4 = scmp.eq.s32.totalorder %s4893_s23, 0 }
  0x92   : > { %p5041_p9 = por %p332_p0, %p60_p3  ;;  %p338_p5 = scmp.eq.s32.totalorder %s3307_s10, 1 }
  0x93   : > { %p5037_p7 = por %p6213_p4, %p66_p13  ;;  %p4248_p1 = scmp.lt.s32.totalorder %s4772_s22, 2 }
  0x94   : > { %s6215_s30 = scalar_select %p5041_p9, 1, 0 }
  0x95   : > { %s6214_s28 = scalar_select %p5037_p7, 1, 0 }
  0x96   : > { %s5046_s13 = scalar_select %p51_p2, %s4760_s19, %s53_s24  }
  0x97   : > { %p5048_p10 = por %p338_p5, %p66_p13  ;;  %s5055_s14 = sand.u32 1, %s4760_s19  }
  0x98   : > { %6216 = sst [smem:[#allocation35_spill]] %s5046_s13  ;;  %s3318_s15 = sshll.u32 %s5055_s14, 6 }
  0x99   : > { %s6217_s26 = scalar_select %p5048_p10, 1, 0 }
  0x9a   : > { %s3563_s16 = sshll.u32 %s4768_s21, 10  ;;  %s6219_s0 = sld [smem:[#allocation48_spill]] }
  0x9b   : > { %6218 = sst [smem:[#allocation36_spill]] %s6217_s26  ;;  %s475_s10 = scalar_lea.vmem [#allocation2], %s3318_s15 }
  0x9c   : > { %s482_s24 = sshll.u32 %s475_s10, 4  ;;  %p5068_p3 = pnand %p4248_p1, %p5026_p12  ;;  %s5064_s24 = int_to_ptr.vmem [resolvable:$true] %s482_s24 }
  0x9d   : > { %s4782_s3 = smov [#allocation10]   ;;  %s6221_s29 = sand.u32 1, %s4772_s22  }
  0x9e   : > { %s6220_s12 = scalar_select %p5068_p3, 1, 0 }
  0x9f   : > { %s5072_s5 = sshll.u32 %s4782_s3, 4  ;;  %s5076_s1 = scalar_lea.sflag [#allocation3], %s6221_s29  ;;  %s393_s5 = int_to_ptr.vmem [resolvable:$true] %s5072_s5 }
  0xa0   : > { %s5062_s2 = scalar_lea.hbm %s6219_s0, %s3563_s16  ;;  %p5082_p13 = pneg %p5068_p3 }
  0xa1   : > { %s4460_s16 = scalar_lea.hbm %s5062_s2, 1024  ;;  %s4465_s7 = scalar_lea.hbm %s6219_s0, 2048 }
  0xa2   : > { %p4461_p11 = scmp.ne.s32.totalorder %s5062_s2, %s4460_s16  ;;  %p4466_p2 = scmp.lt.u32.totalorder %s5062_s2, %s6219_s0 }
  0xa3   : > { %s6222_s15 = scalar_select %p5082_p13, 1, 0 }
  0xa4   : > { %p4463_p12 = pnand %p5082_p13, %p4461_p11  ;;  %p4467_p4 = scmp.lt.u32.totalorder %s4465_s7, %s4460_s16 }
  0xa5   : > { %p4469_p1 = scmp.lt.u32.totalorder %s4460_s16, %s5062_s2 }
  0xa6   : > { %p4464_p0 = pneg %p4463_p12  ;;  %p4468_p5 = por %p4467_p4, %p4466_p2 }
  0xa8   : > { %p4470_p10 = por %p4469_p1, %p4468_p5 }
  0xaa   : > { %p4471_p9 = pnand %p4470_p10, %p4464_p0 }
  0xac   : > { %4474 = shalt.err (!%p4471_p9)
}
  0xad   : > { %s4475_s29 = scalar_lea.vmem %s5064_s24, 1024  ;;  %s4783_s25 = smov [#allocation2]  }
  0xae   : > { %p4476_p11 = scmp.ne.s32.totalorder %s5064_s24, %s4475_s29  ;;  %s4480_s10 = sshll.u32 %s4783_s25, 4  ;;  %s4481_s10 = int_to_ptr.vmem [resolvable:$false] %s4480_s10 }
  0xaf   : > { %s4482_s20 = scalar_lea.vmem %s4481_s10, 2048  ;;  %p4483_p6 = scmp.lt.s32.totalorder %s5064_s24, %s4481_s10 }
  0xb0   : > { %p4478_p12 = pnand %p4476_p11, %p5082_p13  ;;  %p4484_p8 = scmp.lt.s32.totalorder %s4482_s20, %s4475_s29 }
  0xb2   : > { %p4479_p7 = pneg %p4478_p12  ;;  %p4485_p2 = por %p4484_p8, %p4483_p6 }
  0xb4   : > { %p4486_p4 = pnand %p4485_p2, %p4479_p7 }
  0xb6   : > { %4489 = shalt.err (!%p4486_p4)
}
  0xb7   : > { %s6223_s7 = smov 4   ;;  %s6224_s16 = smov 64  }
  0xb8   : > { %4229 = dma.hbm_to_vmem [thread:$0]  (!%p5068_p3), %s5062_s2, 1024, %s5064_s24, %s5076_s1, %s6224_s16, %s6224_s16, %s6223_s7  }
  0xb9   : > { %s6225_s4 = sld [smem:[#allocation52_spill]]  ;;  %p6226_p8 = scmp.ne.s32.totalorder %s6207_s11, 0 }
  0xbf   : > { %s4490_s10 = scalar_lea.hbm %s6225_s4, 16 }
  0xc0   : > { %p4491_p6 = scmp.ne.s32.totalorder %s6225_s4, %s4490_s10  ;;  %p4497_p10 = scmp.lt.u32.totalorder %s4490_s10, %s6225_s4 }
  0xc2   : > { %p4493_p7 = pnand %p4491_p6, %p6226_p8 }
  0xc4   : > { %p4494_p9 = pneg %p4493_p7 }
  0xc6   : > { %p4499_p0 = pnand %p4497_p10, %p4494_p9 }
  0xc8   : > { %4502 = shalt.err (!%p4499_p0)
}
  0xc9   : > { %s4503_s19 = scalar_lea.vmem %s393_s5, 16  ;;  %s4510_s2 = scalar_lea.vmem %s393_s5, 32 }
  0xca   : > { %p4504_p5 = scmp.ne.s32.totalorder %s393_s5, %s4503_s19  ;;  %p4511_p12 = scmp.lt.s32.totalorder %s393_s5, %s393_s5 }
  0xcb   : > { %p4512_p2 = scmp.lt.s32.totalorder %s4510_s2, %s4503_s19 }
  0xcc   : > { %p4506_p1 = pnand %p4504_p5, %p6226_p8 }
  0xcd   : > { %p4513_p4 = por %p4512_p2, %p4511_p12 }
  0xce   : > { %p4507_p11 = pneg %p4506_p1 }
  0xd0   : > { %p4514_p3 = pnand %p4513_p4, %p4507_p11 }
  0xd2   : > { %4517 = shalt.err (!%p4514_p3)
}
  0xd3   : > { %p6227_p6 = scmp.ne.s32.totalorder %s6205_s27, 0  ;;  %s4784_s0 = smov [#allocation13]  }
  0xd4   : > { %s418_s13 = sshll.u32 %s4784_s0, 4  ;;  %s4785_s25 = smov [#allocation16]   ;;  %s419_s13 = int_to_ptr.vmem [resolvable:$true] %s418_s13 }
  0xd5   : > { %4210 = dma.hbm_to_vmem [thread:$0]  (!%p6227_p6), %s6225_s4, 16, %s393_s5, [#allocation9]  }
  0xd6   : > { %s444_s10 = sshll.u32 %s4785_s25, 4  ;;  %s4518_s26 = scalar_lea.hbm %s6148_s6, 2048  ;;  %s445_s10 = int_to_ptr.vmem [resolvable:$true] %s444_s10 }
  0xd7   : > { %p4519_p3 = scmp.ne.s32.totalorder %s6148_s6, %s4518_s26  ;;  %p4525_p10 = scmp.lt.u32.totalorder %s4518_s26, %s6148_s6 }
  0xd9   : > { %p4521_p7 = pnand %p4519_p3, %p6226_p8 }
  0xdb   : > { %p4522_p9 = pneg %p4521_p7 }
  0xdd   : > { %p4527_p0 = pnand %p4525_p10, %p4522_p9 }
  0xdf   : > { %4530 = shalt.err (!%p4527_p0)
}
  0xe0   : > { %s4531_s5 = scalar_lea.vmem %s419_s13, 2048  ;;  %p4539_p12 = scmp.lt.s32.totalorder %s419_s13, %s419_s13 }
  0xe1   : > { %p4532_p5 = scmp.ne.s32.totalorder %s419_s13, %s4531_s5  ;;  %p4540_p2 = scmp.lt.s32.totalorder %s4531_s5, %s4531_s5 }
  0xe3   : > { %p4534_p1 = pnand %p4532_p5, %p6226_p8  ;;  %p4541_p4 = por %p4540_p2, %p4539_p12 }
  0xe5   : > { %p4535_p11 = pneg %p4534_p1 }
  0xe7   : > { %p4542_p13 = pnand %p4541_p4, %p4535_p11 }
  0xe9   : > { %4545 = shalt.err (!%p4542_p13)
}
  0xea   : > { %s6228_s3 = smov 8   ;;  %s6229_s0 = smov 128  }
  0xeb   : > { %4216 = dma.hbm_to_vmem [thread:$0]  (!%p6227_p6), %s6148_s6, 2048, %s419_s13, [#allocation12], %s6229_s0, %s6229_s0, %s6228_s3  }
  0xec   : > { %s4546_s20 = scalar_lea.hbm %s6150_s8, 512 }
  0xed   : > { %p4547_p3 = scmp.ne.s32.totalorder %s6150_s8, %s4546_s20  ;;  %p4553_p9 = scmp.lt.u32.totalorder %s4546_s20, %s6150_s8 }
  0xef   : > { %p4549_p13 = pnand %p4547_p3, %p6226_p8 }
  0xf1   : > { %p4550_p7 = pneg %p4549_p13 }
  0xf3   : > { %p4555_p10 = pnand %p4553_p9, %p4550_p7 }
  0xf5   : > { %4558 = shalt.err (!%p4555_p10)
}
  0xf6   : > { %s4559_s17 = scalar_lea.vmem %s445_s10, 512  ;;  %p4567_p11 = scmp.lt.s32.totalorder %s445_s10, %s445_s10 }
  0xf7   : > { %p4560_p0 = scmp.ne.s32.totalorder %s445_s10, %s4559_s17  ;;  %p4568_p12 = scmp.lt.s32.totalorder %s4559_s17, %s4559_s17 }
  0xf9   : > { %p4562_p5 = pnand %p4560_p0, %p6226_p8  ;;  %p4569_p2 = por %p4568_p12, %p4567_p11 }
  0xfb   : > { %p4563_p1 = pneg %p4562_p5 }
  0xfd   : > { %p4570_p4 = pnand %p4569_p2, %p4563_p1 }
  0xff   : > { %4573 = shalt.err (!%p4570_p4)
}
 0x100   : > { %4222 = dma.hbm_to_vmem [thread:$0]  (!%p6227_p6), %s6150_s8, 512, %s445_s10, [#allocation15], %s6229_s0, %s6229_s0, %s6228_s3  }
 0x101   : > { %s4786_s25 = smov [#allocation17]   ;;  %s3321_s20 = sshll.u32 %s5055_s14, 4 }
 0x102   : > { %s457_s29 = sshll.u32 %s4786_s25, 4  ;;  %s4574_s24 = scalar_lea.hbm %s6151_s9, 512  ;;  %s458_s29 = int_to_ptr.vmem [resolvable:$true] %s457_s29 }
 0x103   : > { %p4575_p3 = scmp.ne.s32.totalorder %s6151_s9, %s4574_s24  ;;  %p4581_p9 = scmp.lt.u32.totalorder %s4574_s24, %s6151_s9 }
 0x105   : > { %p4577_p13 = pnand %p4575_p3, %p6226_p8 }
 0x107   : > { %p4578_p7 = pneg %p4577_p13 }
 0x109   : > { %p4583_p10 = pnand %p4581_p9, %p4578_p7 }
 0x10b   : > { %4586 = shalt.err (!%p4583_p10)
}
 0x10c   : > { %s4587_s10 = scalar_lea.vmem %s458_s29, 512  ;;  %p4595_p11 = scmp.lt.s32.totalorder %s458_s29, %s458_s29 }
 0x10d   : > { %p4588_p0 = scmp.ne.s32.totalorder %s458_s29, %s4587_s10  ;;  %p4596_p12 = scmp.lt.s32.totalorder %s4587_s10, %s4587_s10 }
 0x10f   : > { %p4590_p5 = pnand %p4588_p0, %p6226_p8  ;;  %p4597_p2 = por %p4596_p12, %p4595_p11 }
 0x111   : > { %p4591_p1 = pneg %p4590_p5 }
 0x113   : > { %p4598_p4 = pnand %p4597_p2, %p4591_p1 }
 0x115   : > { %4601 = shalt.err (!%p4598_p4)
}
 0x116   : > { %4225 = dma.hbm_to_vmem [thread:$0]  (!%p6227_p6), %s6151_s9, 512, %s458_s29, [#allocation18], %s6229_s0, %s6229_s0, %s6228_s3  }
 0x117   : > { %s3564_s11 = sshll.u32 %s4768_s21, 8  ;;  %s496_s25 = scalar_lea.vmem [#allocation5], %s3321_s20 }
 0x118   : > { %s503_s19 = sshll.u32 %s496_s25, 4  ;;  %s6230_s5 = sld [smem:[#allocation49_spill]]  ;;  %s5198_s19 = int_to_ptr.vmem [resolvable:$true] %s503_s19 }
 0x119   : > { %s6231_s27 = sand.u32 1, %s4772_s22   ;;  %p6232_p6 = scmp.ne.s32.totalorder %s6222_s15, 0 }
 0x11a   : > { %s5202_s13 = scalar_lea.sflag [#allocation6], %s6231_s27 }
 0x11e   : > { %s5196_s17 = scalar_lea.hbm %s6230_s5, %s3564_s11  ;;  %s4607_s29 = scalar_lea.hbm %s6230_s5, 512 }
 0x11f   : > { %s4602_s10 = scalar_lea.hbm %s5196_s17, 256  ;;  %p4608_p7 = scmp.lt.u32.totalorder %s5196_s17, %s6230_s5 }
 0x120   : > { %p4603_p8 = scmp.ne.s32.totalorder %s5196_s17, %s4602_s10  ;;  %p4609_p9 = scmp.lt.u32.totalorder %s4607_s29, %s4602_s10 }
 0x121   : > { %p4611_p0 = scmp.lt.u32.totalorder %s4602_s10, %s5196_s17 }
 0x122   : > { %p4605_p3 = pnand %p4603_p8, %p6232_p6  ;;  %p4610_p10 = por %p4609_p9, %p4608_p7 }
 0x124   : > { %p4606_p13 = pneg %p4605_p3  ;;  %p4612_p5 = por %p4611_p0, %p4610_p10 }
 0x126   : > { %p4613_p1 = pnand %p4612_p5, %p4606_p13 }
 0x128   : > { %4616 = shalt.err (!%p4613_p1)
}
 0x129   : > { %s4617_s26 = scalar_lea.vmem %s5198_s19, 256  ;;  %s4787_s11 = smov [#allocation5]  }
 0x12a   : > { %p4618_p11 = scmp.ne.s32.totalorder %s5198_s19, %s4617_s26  ;;  %s4622_s25 = sshll.u32 %s4787_s11, 4  ;;  %s4623_s25 = int_to_ptr.vmem [resolvable:$false] %s4622_s25 }
 0x12b   : > { %s4624_s2 = scalar_lea.vmem %s4623_s25, 512  ;;  %p4625_p4 = scmp.lt.s32.totalorder %s5198_s19, %s4623_s25 }
 0x12c   : > { %p4620_p12 = pnand %p4618_p11, %p6232_p6  ;;  %p4626_p8 = scmp.lt.s32.totalorder %s4624_s2, %s4617_s26 }
 0x12e   : > { %p4621_p2 = pneg %p4620_p12  ;;  %p4627_p3 = por %p4626_p8, %p4625_p4 }
 0x130   : > { %p4628_p7 = pnand %p4627_p3, %p4621_p2 }
 0x132   : > { %4631 = shalt.err (!%p4628_p7)
}
 0x133   : > { %p6233_p13 = scmp.ne.s32.totalorder %s6220_s12, 0  ;;  %s3324_s24 = sshll.u32 %s4768_s21, 4 }
 0x134   : > { %s6234_s3 = sld [smem:[#allocation55_spill]]  ;;  %s516_s29 = scalar_lea.vmem [#allocation19], %s5055_s14 }
 0x135   : > { %4232 = dma.hbm_to_vmem [thread:$0]  (!%p6233_p13), %s5196_s17, 256, %s5198_s19, %s5202_s13, %s6224_s16, %s6224_s16, %s6223_s7  }
 0x136   : > { %s523_s20 = sshll.u32 %s516_s29, 4  ;;  %s524_s20 = int_to_ptr.vmem [resolvable:$true] %s523_s20 }
 0x13a   : > { %s5233_s0 = scalar_lea.hbm %s6234_s3, %s3324_s24  ;;  %s4637_s16 = scalar_lea.hbm %s6234_s3, 32 }
 0x13b   : > { %s4632_s4 = scalar_lea.hbm %s5233_s0, 16  ;;  %p4638_p5 = scmp.lt.u32.totalorder %s5233_s0, %s6234_s3 }
 0x13c   : > { %p4633_p9 = scmp.ne.s32.totalorder %s5233_s0, %s4632_s4  ;;  %p4639_p1 = scmp.lt.u32.totalorder %s4637_s16, %s4632_s4 }
 0x13d   : > { %p4641_p12 = scmp.lt.u32.totalorder %s4632_s4, %s5233_s0 }
 0x13e   : > { %p4635_p10 = pnand %p4633_p9, %p6232_p6  ;;  %p4640_p11 = por %p4639_p1, %p4638_p5 }
 0x140   : > { %p4636_p0 = pneg %p4635_p10  ;;  %p4642_p2 = por %p4641_p12, %p4640_p11 }
 0x142   : > { %p4643_p4 = pnand %p4642_p2, %p4636_p0 }
 0x144   : > { %4646 = shalt.err (!%p4643_p4)
}
 0x145   : > { %s4647_s14 = scalar_lea.vmem %s524_s20, 16  ;;  %s4788_s13 = smov [#allocation19]  }
 0x146   : > { %p4648_p8 = scmp.ne.s32.totalorder %s524_s20, %s4647_s14  ;;  %s4652_s11 = sshll.u32 %s4788_s13, 4  ;;  %s4653_s11 = int_to_ptr.vmem [resolvable:$false] %s4652_s11 }
 0x147   : > { %s4654_s25 = scalar_lea.vmem %s4653_s11, 32  ;;  %p4655_p9 = scmp.lt.s32.totalorder %s524_s20, %s4653_s11 }
 0x148   : > { %p4650_p3 = pnand %p4648_p8, %p6232_p6  ;;  %p4656_p10 = scmp.lt.s32.totalorder %s4654_s25, %s4647_s14 }
 0x14a   : > { %p4651_p7 = pneg %p4650_p3  ;;  %p4657_p13 = por %p4656_p10, %p4655_p9 }
 0x14c   : > { %p4658_p1 = pnand %p4657_p13, %p4651_p7 }
 0x14e   : > { %4661 = shalt.err (!%p4658_p1)
}
 0x14f   : > { %p6235_p5 = scmp.ne.s32.totalorder %s6220_s12, 0  ;;  %s6236_s2 = sld [smem:[#allocation33_spill]] }
 0x151   : > { %4235 = dma.hbm_to_vmem [thread:$0]  (!%p6235_p5), %s5233_s0, 16, %s524_s20, %s5076_s1  }
 0x155   : > { %p6237_p0 = scmp.ne.s32.totalorder %s6236_s2, 0 }
 0x157   : > { %532 = sbr.rel (%p6237_p0) target bundleno = 1234 (0x4d2), region = 64 }
 0x15e   : > { %s534_s15 = sand.u32 1, %s4893_s23   ;;  %s5258_s24 = sand.u32 1, %s4756_s18  }
 0x15f   : > { %s3326_s27 = sshll.u32 %s5258_s24, 6  ;;  %s535_s10 = scalar_lea.sflag [#allocation3], %s534_s15 }
 0x160   : > { %s5261_s29 = scalar_lea.vmem [#allocation2], %s3326_s27  ;;  %p6238_p6 = scmp.ne.s32.totalorder %s6214_s28, 0 }
 0x162   : > { %4715 = dma.done.wait (%p6238_p6), %s535_s10, 1024  }
 0x163   : > { %4717 = vsyncadd (%p6238_p6), %s535_s10, 4294966272  ;;  %s3327_s12 = sshll.u32 %s5258_s24, 4  ;;  %s544_s1 = scalar_lea.sflag [#allocation6], %s534_s15 }
 0x164   : > { %s5268_s0 = scalar_lea.vmem [#allocation5], %s3327_s12 }
 0x165   : > { %4719 = dma.done.wait (%p6238_p6), %s544_s1, 256  }
 0x166   : > { %4721 = vsyncadd (%p6238_p6), %s544_s1, 4294967040  ;;  %p6239_p13 = scmp.eq.s32.totalorder %s4893_s23, 0 }
 0x168   : > { %4723 = dma.done.wait (%p6239_p13), [#allocation6], 256   ;;  %p6240_p11 = pmov %p6239_p13 }
 0x16a   : > { %4725 = vsyncadd (%p6240_p11), [#allocation6], 4294967040  ;;  %p6241_p12 = pmov %p6240_p11 }
 0x16b   : > { %p6242_p2 = pmov %p6240_p11 }
 0x16c   : > { %4727 = dma.done.wait (%p6241_p12), [#allocation9], 528  }
 0x16d   : > { %4729 = vsyncadd (%p6242_p2), [#allocation9], 4294966768  ;;  %p6243_p4 = pmov %p6242_p2 }
 0x16e   : > { %p6244_p8 = pmov %p6242_p2 }
 0x16f   : > { %4731 = dma.done.wait (%p6243_p4), [#allocation12], 3072  }
 0x170   : > { %4733 = vsyncadd (%p6244_p8), [#allocation12], 4294964224  ;;  %p6245_p3 = pmov %p6242_p2 }
 0x171   : > { %p6246_p7 = pmov %p6242_p2 }
 0x172   : > { %4735 = dma.done.wait (%p6245_p3), [#allocation15], 2560  }
 0x173   : > { %4737 = vsyncadd (%p6246_p7), [#allocation15], 4294964736  ;;  %p6247_p9 = pmov %p6242_p2 }
 0x174   : > { %p6248_p10 = pmov %p6242_p2 }
 0x175   : > { %4739 = dma.done.wait (%p6247_p9), [#allocation18], 512  }
 0x176   : > { %4741 = vsyncadd (%p6248_p10), [#allocation18], 4294966784  ;;  %s587_s20 = scalar_lea.vmem [#allocation19], %s5258_s24 }
 0x177   : > { %4743 = dma.done.wait (%p6238_p6), %s535_s10, 16  }
 0x178   : > { %4745 = vsyncadd (%p6238_p6), %s535_s10, 4294967280  ;;  %v4332_v0 = vld [vmem:[#allocation7] sm:$0xff]   ;;  %v4333_v1 = vld [vmem:[#allocation7 + $0x8] sm:$0xff]   ;;  %vm720_vm0 = vcmask 261120   ;;  %s4789_s23 = smov 32   ;;  %v4790_v48 = vmov 0  }
 0x179   : > { %3909 = vmatprep.subr.bf16.mxu0 %v4332_v0  ;;  %4085 = vmatprep.subr.bf16.mxu1 %v4332_v0  ;;  %v4334_v2 = vld [vmem:[%s5261_s29] sm:$0xff]   ;;  %v4336_v3 = vld [vmem:[%s5261_s29 + $0x30] sm:$0xff]   ;;  %v4335_v4 = vld [vmem:[%s5261_s29 + $0x8] sm:$0xff]   ;;  %s4791_s28 = smov 96   ;;  %s4792_s4 = smov 88   ;;  %vm1613_vm1 = vcmask 1043456  }
 0x17a   : > { %3910 = vmatpush3.bf16.msra.mxu0 %v4332_v0  ;;  %4087 = vmatpush3.bf16.msra.mxu1 %v4332_v0  ;;  %v4337_v5 = vld [vmem:[%s5261_s29 + $0x38] sm:$0xff]   ;;  %v4338_v6 = vld [vmem:[%s5261_s29 + $0x10] sm:$0xff]   ;;  %v5308_v7 = vld [vmem:[#allocation13 + $0x10] sm:$0xff]  ;;  %s4793_s26 = smov 120   ;;  %s4794_s7 = smov 80   ;;  %vm1588_vm2 = vcmask 64512  }
 0x17b   : > { %3911 = vmatprep.subr.bf16.mxu0 %v4333_v1  ;;  %4086 = vmatprep.subr.bf16.mxu1 %v4333_v1  ;;  %v5310_v8 = vld [vmem:[#allocation13] sm:$0xff]  ;;  %v5317_v9 = vld [vmem:[#allocation13 + $0x18] sm:$0xff]  ;;  %v5319_v10 = vld [vmem:[#allocation13 + $0x8] sm:$0xff]  ;;  %s4795_s16 = smov 72   ;;  %s4796_s19 = smov 112  }
 0x17c   : > { %3913 = vmatprep.mubr.msk.bf16.mxu0 %vm720_vm0, %v4334_v2  ;;  %3925 = vmatprep.mubr.msk.bf16.mxu1 %vm720_vm0, %v4336_v3  ;;  %v4339_v11 = vld [vmem:[%s5261_s29 + $0x18] sm:$0xff]   ;;  %v4340_v12 = vld [vmem:[%s5261_s29 + $0x20] sm:$0xff]   ;;  %v4341_v15 = vld [vmem:[%s5261_s29 + $0x28] sm:$0xff]   ;;  %s4797_s17 = smov 104   ;;  %s3336_s14 = sshll.u32 %s5258_s24, 8 }
 0x17d   : > { %1084 = vrot.lane.b32.xlu1 %v5308_v7, %s4789_s23  ;;  %1080 = vrot.lane.b32.xlu0 %v5310_v8, %s4789_s23  ;;  %v5327_v13 = vld [vmem:[#allocation13 + $0x28] sm:$0xff]  ;;  %v5329_v14 = vld [vmem:[#allocation13 + $0x20] sm:$0xff]  ;;  %v5338_v16 = vld [vmem:[#allocation13 + $0x38] sm:$0xff]  ;;  %s5944_s13 = scalar_lea.vmem [#allocation20], %s3336_s14  ;;  %s6273_s11 = sld [smem:[#allocation32_spill]] }
 0x17e   : > { %3912 = vmatpush3.bf16.msra.mxu0 %v4333_v1  ;;  %4088 = vmatpush3.bf16.msra.mxu1 %v4333_v1  ;;  %v5340_v17 = vld [vmem:[#allocation13 + $0x30] sm:$0xff]  ;;  %v4344_v20 = vld [vmem:[#allocation8] sm:$0xff]   ;;  %v5348_v21 = vld [vmem:[#allocation13 + $0x48] sm:$0xff]  ;;  %s3098_s2 = sshll.u32 %s5944_s13, 4  ;;  %s6274_s10 = sld [smem:[#allocation56_spill]]  ;;  %s6091_s2 = int_to_ptr.vmem [resolvable:$true] %s3098_s2 }
 0x17f   : > { %v4342_v18 = vld [vmem:[%s5268_s0] sm:$0xff]   ;;  %v4343_v19 = vld [vmem:[%s5268_s0 + $0x8] sm:$0xff]   ;;  %4330 = vset.pattern.permute.xlu0 %v4790_v48  ;;  %4331 = vset.pattern.permute.xlu1 %v4790_v48  ;;  %s3082_s12 = scalar_lea.sflag [#allocation4], %s5258_s24  ;;  %s4662_s1 = scalar_lea.vmem %s6091_s2, 4096 }
 0x180   : > { %3929 = vmatprep.subr.bf16.mxu1 %v4342_v18  ;;  %v5350_v22 = vld [vmem:[#allocation13 + $0x40] sm:$0xff]  ;;  %v5358_v24 = vld [vmem:[#allocation13 + $0x58] sm:$0xff]  ;;  %v4346_v25 = vld [vmem:[#allocation8 + $0x10] sm:$0xff]   ;;  %p4663_p1 = scmp.ne.s32.totalorder %s6091_s2, %s4662_s1  ;;  %p6275_p5 = scmp.ne.s32.totalorder %s6215_s30, 0 }
 0x181   : > { %3914 = vmatmul.mubr.msk.bf16.vlgmr.msra.gmra.mrb[0].mxu0 %vm720_vm0, %v4335_v4  ;;  %3926 = vmatmul.mubr.msk.bf16.vlgmr.msra.gmra.mrb[0].mxu1 %vm720_vm0, %v4337_v5  ;;  %v4345_v23 = vld [vmem:[#allocation8 + $0x8] sm:$0xff]   ;;  %v5360_v26 = vld [vmem:[#allocation13 + $0x50] sm:$0xff]  ;;  %v1022_v30 = vld [vmem:[#allocation13 + $0x78] sm:$0xff]  ;;  %s4799_s0 = smov [#allocation20]  }
 0x182   : > { %3917 = vmatprep.mubr.msk.bf16.mxu0 %vm720_vm0, %v4338_v6  ;;  %1086 = vrot.lane.b32.xlu1 %v5317_v9, %s4789_s23  ;;  %v5367_v27 = vld [vmem:[#allocation13 + $0x68] sm:$0xff]  ;;  %v5370_v28 = vld [vmem:[#allocation13 + $0x60] sm:$0xff]  ;;  %v4347_v29 = vld [vmem:[#allocation8 + $0x18] sm:$0xff]   ;;  %p4664_p0 = pnand %p4663_p1, %p6275_p5 }
 0x183   : > { %1082 = vrot.lane.b32.xlu0 %v5319_v10, %s4789_s23  ;;  %3930 = vmatpush3.bf16.msra.mxu1 %v4342_v18  ;;  %v1021_v31 = vld [vmem:[#allocation13 + $0x70] sm:$0xff]  ;;  %v5379_v32 = vld [vmem:[#allocation14 + $0x8] sm:$0xff]  ;;  %v5381_v33 = vld [vmem:[#allocation14] sm:$0xff]  ;;  %s3629_s25 = sshll.u32 %s6273_s11, 12 }
 0x184   : > { %3931 = vmatprep.subr.bf16.mxu1 %v4343_v19  ;;  %3933 = vmatprep.mubr.msk.bf16.mxu1 %vm720_vm0, %v4344_v20  ;;  %v5387_v34 = vld [vmem:[#allocation14 + $0x18] sm:$0xff]  ;;  %v5389_v35 = vld [vmem:[#allocation14 + $0x10] sm:$0xff]  ;;  %v5395_v36 = vld [vmem:[#allocation14 + $0x28] sm:$0xff]  ;;  %s6089_s29 = scalar_lea.hbm %s6274_s10, %s3629_s25  ;;  %p4665_p6 = pneg %p4664_p0 }
 0x185   : > { %v5397_v37 = vld [vmem:[#allocation14 + $0x20] sm:$0xff]  ;;  %v5403_v38 = vld [vmem:[#allocation14 + $0x38] sm:$0xff]  ;;  %v5405_v39 = vld [vmem:[#allocation14 + $0x30] sm:$0xff] }
 0x186   : > { %1090 = vrot.lane.b32.xlu1 %v5327_v13, %s4789_s23  ;;  %v5411_v40 = vld [vmem:[#allocation14 + $0x48] sm:$0xff]  ;;  %v5413_v41 = vld [vmem:[#allocation14 + $0x40] sm:$0xff]  ;;  %v5419_v42 = vld [vmem:[#allocation14 + $0x58] sm:$0xff] }
 0x187   : > { %1088 = vrot.lane.b32.xlu0 %v5329_v14, %s4789_s23  ;;  %3932 = vmatpush3.bf16.msra.mxu1 %v4343_v19  ;;  %6249 = vst [vmem:[#allocation37_spill] sm:$0xff] %v5419_v42  ;;  %v5421_v43 = vld [vmem:[#allocation14 + $0x50] sm:$0xff]  ;;  %v5427_v44 = vld [vmem:[#allocation14 + $0x68] sm:$0xff]  ;;  %v5429_v45 = vld [vmem:[#allocation14 + $0x60] sm:$0xff] }
 0x188   : > { %6250 = vst [vmem:[#allocation38_spill] sm:$0xff] %v5421_v43  ;;  %6251 = vst [vmem:[#allocation39_spill] sm:$0xff] %v5427_v44  ;;  %v5435_v46 = vld [vmem:[#allocation14 + $0x78] sm:$0xff]  ;;  %v5437_v47 = vld [vmem:[#allocation14 + $0x70] sm:$0xff] }
 0x189   : > { %3918 = vmatmul.mubr.msk.bf16.gmra.mrb[4].mxu0 %vm720_vm0, %v4339_v11  ;;  %6252 = vst [vmem:[#allocation40_spill] sm:$0xff] %v5429_v45  ;;  %6253 = vst [vmem:[#allocation41_spill] sm:$0xff] %v5435_v46  ;;  %v3337_v49 = vld [vmem:[#allocation10] ss:$0 sm:$0xff] }
 0x18a   : > { %3921 = vmatprep.mubr.msk.bf16.mxu0 %vm720_vm0, %v4340_v12  ;;  %1094 = vrot.lane.b32.xlu1 %v5338_v16, %s4789_s23  ;;  %6254 = vst [vmem:[#allocation42_spill] sm:$0xff] %v5437_v47 }
 0x18b   : > { %1092 = vrot.lane.b32.xlu0 %v5340_v17, %s4789_s23  ;;  %3934 = vmatmul.mubr.msk.bf16.vlgmr.msra.gmra.mrb[4].mxu1 %vm720_vm0, %v4345_v23 }
 0x18c   : > { %3937 = vmatprep.mubr.msk.bf16.mxu1 %vm720_vm0, %v4346_v25 }
 0x18e   : > { %1098 = vrot.lane.b32.xlu1 %v5348_v21, %s4789_s23 }
 0x18f   : > { %1096 = vrot.lane.b32.xlu0 %v5350_v22, %s4789_s23 }
 0x191   : > { %3922 = vmatmul.mubr.msk.bf16.gmra.mrb[8].mxu0 %vm720_vm0, %v4341_v15 }
 0x192   : > { %1102 = vrot.lane.b32.xlu1 %v5358_v24, %s4789_s23 }
 0x193   : > { %1100 = vrot.lane.b32.xlu0 %v5360_v26, %s4789_s23  ;;  %3938 = vmatmul.mubr.msk.bf16.gmra.mrb[8].mxu1 %vm720_vm0, %v4347_v29 }
 0x196   : > { %1106 = vrot.lane.b32.xlu1 %v5367_v27, %s4789_s23 }
 0x197   : > { %1104 = vrot.lane.b32.xlu0 %v5370_v28, %s4789_s23 }
 0x19a   : > { %1110 = vrot.lane.b32.xlu1 %v1022_v30, %s4789_s23 }
 0x19b   : > { %1108 = vrot.lane.b32.xlu0 %v1021_v31, %s4789_s23 }
 0x19e   : > { %1242 = vrot.lane.b32.xlu1 %v5379_v32, %s4789_s23 }
 0x19f   : > { %1240 = vrot.lane.b32.xlu0 %v5381_v33, %s4789_s23 }
 0x1a2   : > { %1246 = vrot.lane.b32.xlu1 %v5387_v34, %s4789_s23 }
 0x1a3   : > { %1244 = vrot.lane.b32.xlu0 %v5389_v35, %s4789_s23 }
 0x1a6   : > { %1250 = vrot.lane.b32.xlu1 %v5395_v36, %s4789_s23 }
 0x1a7   : > { %1248 = vrot.lane.b32.xlu0 %v5397_v37, %s4789_s23 }
 0x1aa   : > { %1254 = vrot.lane.b32.xlu1 %v5403_v38, %s4789_s23 }
 0x1ab   : > { %1252 = vrot.lane.b32.xlu0 %v5405_v39, %s4789_s23 }
 0x1ae   : > { %1258 = vrot.lane.b32.xlu1 %v5411_v40, %s4789_s23 }
 0x1af   : > { %1256 = vrot.lane.b32.xlu0 %v5413_v41, %s4789_s23 }
 0x1b2   : > { %1262 = vrot.lane.b32.xlu1 %v5419_v42, %s4789_s23 }
 0x1b3   : > { %1260 = vrot.lane.b32.xlu0 %v5421_v43, %s4789_s23 }
 0x1b6   : > { %1266 = vrot.lane.b32.xlu1 %v5427_v44, %s4789_s23 }
 0x1b7   : > { %1264 = vrot.lane.b32.xlu0 %v5429_v45, %s4789_s23 }
 0x1ba   : > { %1270 = vrot.lane.b32.xlu1 %v5435_v46, %s4789_s23 }
 0x1bb   : > { %1268 = vrot.lane.b32.xlu0 %v5437_v47, %s4789_s23 }
 0x254   : > { %v3915_v50 = vpop.f32.mrb[0].mxu0  ;;  %v3927_v51 = vpop.f32.mrb[0].mxu1 }
 0x255   : > { %v5443_v52 = vadd.f32 %v3915_v50, %v3337_v49  ;;  %v779_v53 = vpop.f32.mrb[1].mxu0  ;;  %v5445_v54 = vadd.f32 %v3927_v51, %v3337_v49  ;;  %v827_v55 = vpop.f32.mrb[1].mxu1 }
 0x256   : > { %v3916_v56 = vpop.f32.mrb[2].mxu0  ;;  %v3928_v57 = vpop.f32.mrb[2].mxu1  ;;  %v5457_v1 = vadd.f32 %v3337_v49, %v779_v53 }
 0x257   : > { %v5447_v58 = vadd.f32 %v3916_v56, %v3337_v49  ;;  %v782_v59 = vpop.f32.mrb[3].mxu0  ;;  %v830_v60 = vpop.f32.mrb[3].mxu1  ;;  %v1306_v61 = vmul.f32 %v5308_v7, %v5443_v52  ;;  %v5451_v62 = vadd.f32 %v3928_v57, %v3337_v49  ;;  %v1318_v0 = vmul.f32 %v1021_v31, %v5445_v54 }
 0x258   : > { %v5460_v3 = vadd.f32 %v3337_v49, %v782_v59  ;;  %v5464_v7 = vadd.f32 %v3337_v49, %v827_v55  ;;  %v5469_v12 = vadd.f32 %v3337_v49, %v830_v60  ;;  %v1085_v56 = vpop.permute.xlu1 %1084 }
 0x259   : > { %1340 = vrot.lane.b32.xlu0 %v1306_v61, %s4789_s23  ;;  %v1307_v63 = vmul.f32 %v5317_v9, %v5447_v58  ;;  %v1319_v4 = vmul.f32 %v1022_v30, %v5451_v62  ;;  %v1304_v9 = vmul.f32 %v5310_v8, %v5457_v1 }
 0x25a   : > { %v1305_v18 = vmul.f32 %v5319_v10, %v5460_v3  ;;  %v1316_v19 = vmul.f32 %v5370_v28, %v5464_v7  ;;  %v1317_v8 = vmul.f32 %v5367_v27, %v5469_v12  ;;  %v1081_v27 = vpop.permute.xlu0 %1080 }
 0x25b   : > { %1342 = vrot.lane.b32.xlu1 %v1307_v63, %s4789_s23 }
 0x25c   : > { %v3919_v2 = vpop.f32.mrb[4].mxu0  ;;  %v1087_v60 = vpop.permute.xlu1 %1086 }
 0x25d   : > { %1364 = vrot.lane.b32.xlu0 %v1318_v0, %s4789_s23  ;;  %v795_v5 = vpop.f32.mrb[5].mxu0  ;;  %v5471_v15 = vadd.f32 %v3919_v2, %v3337_v49 }
 0x25e   : > { %v3920_v6 = vpop.f32.mrb[6].mxu0  ;;  %v5486_v31 = vadd.f32 %v3337_v49, %v795_v5  ;;  %v1083_v59 = vpop.permute.xlu0 %1082 }
 0x25f   : > { %1366 = vrot.lane.b32.xlu1 %v1319_v4, %s4789_s23  ;;  %v798_v11 = vpop.f32.mrb[7].mxu0  ;;  %v5479_v23 = vadd.f32 %v3920_v6, %v3337_v49  ;;  %v1310_v25 = vmul.f32 %v5340_v17, %v5471_v15  ;;  %v5524_v63 = vpop.f32.mrb[4].mxu1  ;;  %v850_v4 = vld [vmem:[#allocation11] sm:$0xff] }
 0x260   : > { %v5489_v48 = vadd.f32 %v3337_v49, %v798_v11  ;;  %v1308_v17 = vmul.f32 %v5329_v14, %v5486_v31  ;;  %6255 = vst [vmem:[#allocation43_spill] sm:$0xff] %v5524_v63  ;;  %v1091_v0 = vpop.permute.xlu1 %1090  ;;  %v5528_v2 = vpop.f32.mrb[5].mxu1  ;;  %v851_v11 = vld [vmem:[#allocation11 + $0x8] sm:$0xff] }
 0x261   : > { %1336 = vrot.lane.b32.xlu0 %v1304_v9, %s4789_s23  ;;  %v1311_v50 = vmul.f32 %v5338_v16, %v5479_v23  ;;  %v5532_v5 = vpop.f32.mrb[6].mxu1 }
 0x262   : > { %v1309_v53 = vmul.f32 %v5327_v13, %v5489_v48  ;;  %v1089_v61 = vpop.permute.xlu0 %1088  ;;  %6256 = vst [vmem:[#allocation44_spill] sm:$0xff] %v5532_v5  ;;  %v5535_v9 = vpop.f32.mrb[7].mxu1 }
 0x263   : > { %1338 = vrot.lane.b32.xlu1 %v1305_v18, %s4789_s23 }
 0x264   : > { %v3923_v20 = vpop.f32.mrb[8].mxu0  ;;  %v1095_v18 = vpop.permute.xlu1 %1094 }
 0x265   : > { %1360 = vrot.lane.b32.xlu0 %v1316_v19, %s4789_s23  ;;  %v811_v29 = vpop.f32.mrb[9].mxu0  ;;  %v5491_v28 = vadd.f32 %v3923_v20, %v3337_v49  ;;  %v855_v19 = vld [vmem:[#allocation11 + $0x28] sm:$0xff] }
 0x266   : > { %v3924_v30 = vpop.f32.mrb[10].mxu0  ;;  %v5506_v57 = vadd.f32 %v3337_v49, %v811_v29  ;;  %v1093_v6 = vpop.permute.xlu0 %1092 }
 0x267   : > { %1362 = vrot.lane.b32.xlu1 %v1317_v8, %s4789_s23  ;;  %v814_v10 = vpop.f32.mrb[11].mxu0  ;;  %v5499_v51 = vadd.f32 %v3924_v30, %v3337_v49  ;;  %v1314_v55 = vmul.f32 %v5360_v26, %v5491_v28  ;;  %v5537_v20 = vpop.f32.mrb[8].mxu1  ;;  %v854_v8 = vld [vmem:[#allocation11 + $0x20] sm:$0xff] }
 0x268   : > { %v5509_v16 = vadd.f32 %v3337_v49, %v814_v10  ;;  %v1312_v13 = vmul.f32 %v5350_v22, %v5506_v57  ;;  %v1128_v49 = vmul.f32 %v1081_v27, %v5457_v1  ;;  %v1130_v22 = vmul.f32 %v1085_v56, %v5443_v52  ;;  %6257 = vst [vmem:[#allocation45_spill] sm:$0xff] %v5537_v20  ;;  %v1099_v27 = vpop.permute.xlu1 %1098 }
 0x269   : > { %1348 = vrot.lane.b32.xlu0 %v1310_v25, %s4789_s23  ;;  %v1315_v14 = vmul.f32 %v5358_v24, %v5499_v51  ;;  %v1129_v24 = vmul.f32 %v1083_v59, %v5460_v3  ;;  %v5539_v25 = vpop.f32.mrb[9].mxu1  ;;  %v6182_v10 = vlaneseq }
 0x26a   : > { %v1313_v26 = vmul.f32 %v5348_v21, %v5509_v16  ;;  %v1131_v21 = vmul.f32 %v1087_v60, %v5447_v58  ;;  %v1097_v29 = vpop.permute.xlu0 %1096  ;;  %v5541_v30 = vpop.f32.mrb[10].mxu1  ;;  %v1135_v60 = vmul.f32 %v1095_v18, %v5479_v23 }
 0x26b   : > { %1350 = vrot.lane.b32.xlu1 %v1311_v50, %s4789_s23  ;;  %6258 = vst [vmem:[#allocation46_spill] sm:$0xff] %v5541_v30  ;;  %v5543_v50 = vpop.f32.mrb[11].mxu1 }
 0x26d   : > { %1344 = vrot.lane.b32.xlu0 %v1308_v17, %s4789_s23  ;;  %v5547_v17 = vld [vmem:[%s587_s20] sm:$0x1]  ;;  %s4666_s20 = sshll.u32 %s4799_s0, 4  ;;  %s4667_s20 = int_to_ptr.vmem [resolvable:$false] %s4666_s20 }
 0x26e   : > { %v1525_v56 = vsub.f32 1.0, %v5547_v17  ;;  %p4669_p13 = scmp.lt.s32.totalorder %s6091_s2, %s4667_s20 }
 0x26f   : > { %1346 = vrot.lane.b32.xlu1 %v1309_v53, %s4789_s23  ;;  %v1133_v53 = vmul.f32 %v1091_v0, %v5489_v48 }
 0x271   : > { %1356 = vrot.lane.b32.xlu0 %v1314_v55, %s4789_s23  ;;  %v5551_v55 = vshrl.u32 %v6182_v10, 7 }
 0x273   : > { %1358 = vrot.lane.b32.xlu1 %v1315_v14, %s4789_s23  ;;  %v1132_v14 = vmul.f32 %v1089_v61, %v5486_v31  ;;  %v6183_v59 = vsub.s32 0, %v5551_v55 }
 0x275   : > { %1352 = vrot.lane.b32.xlu0 %v1312_v13, %s4789_s23  ;;  %v1101_v13 = vpop.permute.xlu0 %1100 }
 0x277   : > { %1354 = vrot.lane.b32.xlu1 %v1313_v26, %s4789_s23  ;;  %v5561_v26 = vrot.slane %v1525_v56, %v6183_v59  ;;  %s4668_s23 = scalar_lea.vmem %s4667_s20, 8192 }
 0x278   : > { %p4670_p11 = scmp.lt.s32.totalorder %s4668_s23, %s4662_s1 }
 0x279   : > { %1160 = vrot.lane.b32.xlu0 %v1128_v49, %s4791_s28  ;;  %6259 = vst [vmem:[#allocation47_spill] sm:$0xff] %v5561_v26  ;;  %v1103_v49 = vpop.permute.xlu1 %1102  ;;  %v1105_v0 = vpop.permute.xlu0 %1104 }
 0x27a   : > { %v1139_v61 = vmul.f32 %v1103_v49, %v5499_v51  ;;  %p4671_p12 = por %p4670_p11, %p4669_p13 }
 0x27b   : > { %1162 = vrot.lane.b32.xlu1 %v1129_v24, %s4791_s28  ;;  %v1134_v24 = vmul.f32 %v1093_v6, %v5471_v15 }
 0x27c   : > { %p4672_p2 = pnand %p4671_p12, %p4665_p6 }
 0x27d   : > { %1164 = vrot.lane.b32.xlu0 %v1130_v22, %s4791_s28  ;;  %v1136_v22 = vmul.f32 %v1097_v29, %v5506_v57  ;;  %v1109_v18 = vpop.permute.xlu0 %1108 }
 0x27f   : > { %1166 = vrot.lane.b32.xlu1 %v1131_v21, %s4791_s28  ;;  %v1107_v21 = vpop.permute.xlu1 %1106 }
 0x280   : > { %v1141_v6 = vmul.f32 %v1107_v21, %v5469_v12 }
 0x281   : > { %860 = vperm.xlu0 %4330, %v850_v4   ;;  %v1137_v4 = vmul.f32 %v1099_v27, %v5509_v16  ;;  %v1142_v27 = vmul.f32 %v1109_v18, %v5445_v54 }
 0x283   : > { %865 = vperm.xlu1 %4331, %v851_v11   ;;  %v1138_v11 = vmul.f32 %v1101_v13, %v5491_v28 }
 0x285   : > { %885 = vperm.xlu0 %4330, %v855_v19   ;;  %v1111_v19 = vpop.permute.xlu1 %1110 }
 0x286   : > { %v1143_v29 = vmul.f32 %v1111_v19, %v5451_v62 }
 0x287   : > { %880 = vperm.xlu1 %4331, %v854_v8   ;;  %v1140_v8 = vmul.f32 %v1105_v0, %v5464_v7 }
 0x289   : > { %1170 = vrot.lane.b32.xlu0 %v1133_v53, %s4791_s28  ;;  %v1241_v53 = vpop.permute.xlu0 %1240  ;;  %v1243_v56 = vpop.permute.xlu1 %1242 }
 0x28b   : > { %1168 = vrot.lane.b32.xlu1 %v1132_v14, %s4791_s28 }
 0x28d   : > { %1174 = vrot.lane.b32.xlu0 %v1135_v60, %s4791_s28  ;;  %v1245_v14 = vpop.permute.xlu0 %1244  ;;  %v1247_v13 = vpop.permute.xlu1 %1246 }
 0x28f   : > { %1172 = vrot.lane.b32.xlu1 %v1134_v24, %s4791_s28 }
 0x291   : > { %1182 = vrot.lane.b32.xlu0 %v1139_v61, %s4791_s28  ;;  %v1249_v60 = vpop.permute.xlu0 %1248  ;;  %v1251_v49 = vpop.permute.xlu1 %1250 }
 0x293   : > { %1176 = vrot.lane.b32.xlu1 %v1136_v22, %s4791_s28 }
 0x295   : > { %1178 = vrot.lane.b32.xlu0 %v1137_v4, %s4791_s28  ;;  %v1253_v24 = vpop.permute.xlu0 %1252  ;;  %v1255_v61 = vpop.permute.xlu1 %1254 }
 0x297   : > { %1180 = vrot.lane.b32.xlu1 %v1138_v11, %s4791_s28 }
 0x299   : > { %1186 = vrot.lane.b32.xlu0 %v1141_v6, %s4791_s28  ;;  %v5582_v22 = vpop.permute.xlu0 %1256  ;;  %v5584_v0 = vpop.permute.xlu1 %1258 }
 0x29b   : > { %1184 = vrot.lane.b32.xlu1 %v1140_v8, %s4791_s28 }
 0x29d   : > { %1190 = vrot.lane.b32.xlu0 %v1143_v29, %s4791_s28  ;;  %v1261_v21 = vpop.permute.xlu0 %1260  ;;  %v1263_v4 = vpop.permute.xlu1 %1262  ;;  %v1290_v29 = vmul.f32 %v1245_v14, %v5443_v52  ;;  %v1288_v14 = vmul.f32 %v1241_v53, %v5457_v1 }
 0x29f   : > { %1188 = vrot.lane.b32.xlu1 %v1142_v27, %s4791_s28  ;;  %v1291_v27 = vmul.f32 %v1247_v13, %v5447_v58  ;;  %v1289_v13 = vmul.f32 %v1243_v56, %v5460_v3 }
 0x2a1   : > { %v1265_v11 = vpop.permute.xlu0 %1264  ;;  %v1267_v6 = vpop.permute.xlu1 %1266 }
 0x2a5   : > { %v1269_v19 = vpop.permute.xlu0 %1268  ;;  %v1271_v8 = vpop.permute.xlu1 %1270 }
 0x2a6   : > { %v1303_v5 = vmul.f32 %v1271_v8, %v5451_v62  ;;  %v1302_v20 = vmul.f32 %v1269_v19, %v5445_v54  ;;  %v1300_v19 = vmul.f32 %v1265_v11, %v5464_v7  ;;  %v1293_v8 = vmul.f32 %v1251_v49, %v5489_v48 }
 0x2cb   : > { %v1341_v18 = vpop.permute.xlu0 %1340 }
 0x2cc   : > { %v1386_v59 = vadd.f32 %v1341_v18, %v1290_v29 }
 0x2cd   : > { %v1343_v10 = vpop.permute.xlu1 %1342 }
 0x2ce   : > { %v1387_v26 = vadd.f32 %v1343_v10, %v1291_v27 }
 0x2cf   : > { %v1365_v30 = vpop.permute.xlu0 %1364 }
 0x2d0   : > { %v5590_v63 = vpack.c.bf16 %v1387_v26, %v1386_v59  ;;  %v1398_v46 = vadd.f32 %v1365_v30, %v1302_v20  ;;  %v1301_v59 = vmul.f32 %v1267_v6, %v5469_v12  ;;  %v1292_v6 = vmul.f32 %v1249_v60, %v5486_v31 }
 0x2d1   : > { %v1367_v47 = vpop.permute.xlu1 %1366 }
 0x2d2   : > { %v1399_v45 = vadd.f32 %v1367_v47, %v1303_v5 }
 0x2d3   : > { %v1337_v44 = vpop.permute.xlu0 %1336 }
 0x2d4   : > { %v5592_v43 = vpack.c.bf16 %v1399_v45, %v1398_v46  ;;  %v1384_v18 = vadd.f32 %v1337_v44, %v1288_v14  ;;  %v1295_v46 = vmul.f32 %v1255_v61, %v5479_v23 }
 0x2d5   : > { %v1339_v42 = vpop.permute.xlu1 %1338 }
 0x2d6   : > { %v1385_v10 = vadd.f32 %v1339_v42, %v1289_v13  ;;  %v1294_v42 = vmul.f32 %v1253_v24, %v5471_v15 }
 0x2d7   : > { %v1361_v29 = vpop.permute.xlu0 %1360 }
 0x2d8   : > { %v5596_v27 = vpack.c.bf16 %v1385_v10, %v1384_v18  ;;  %v1396_v20 = vadd.f32 %v1361_v29, %v1300_v19  ;;  %v1298_v10 = vmul.f32 %v1261_v21, %v5491_v28  ;;  %v1299_v29 = vmul.f32 %v1263_v4, %v5499_v51 }
 0x2d9   : > { %v1363_v26 = vpop.permute.xlu1 %1362  ;;  %v1297_v21 = vmul.f32 %v5584_v0, %v5509_v16 }
 0x2da   : > { %v1397_v47 = vadd.f32 %v1363_v26, %v1301_v59  ;;  %1572 = vrot.lane.b32.xlu1 %v5596_v27, %s4791_s28  ;;  %1934 = vrot.lane.b32.xlu0 %v5596_v27, %s4792_s4 }
 0x2db   : > { %v1349_v45 = vpop.permute.xlu0 %1348 }
 0x2dc   : > { %v5604_v44 = vpack.c.bf16 %v1397_v47, %v1396_v20  ;;  %v1390_v30 = vadd.f32 %v1349_v45, %v1294_v42  ;;  %v1296_v20 = vmul.f32 %v5582_v22, %v5506_v57  ;;  %v1049_v22 = vmul.f32 %v5379_v32, %v5460_v3 }
 0x2dd   : > { %v1351_v5 = vpop.permute.xlu1 %1350 }
 0x2de   : > { %v1391_v53 = vadd.f32 %v1351_v5, %v1295_v46  ;;  %1574 = vrot.lane.b32.xlu1 %v5590_v63, %s4791_s28  ;;  %1936 = vrot.lane.b32.xlu0 %v5590_v63, %s4792_s4  ;;  %v1048_v5 = vmul.f32 %v5381_v33, %v5457_v1  ;;  %v1051_v33 = vmul.f32 %v5387_v34, %v5447_v58 }
 0x2df   : > { %v1345_v56 = vpop.permute.xlu0 %1344 }
 0x2e0   : > { %v5612_v11 = vpack.c.bf16 %v1391_v53, %v1390_v30  ;;  %v1388_v24 = vadd.f32 %v1345_v56, %v1292_v6 }
 0x2e1   : > { %v1347_v14 = vpop.permute.xlu1 %1346 }
 0x2e2   : > { %v1389_v13 = vadd.f32 %v1347_v14, %v1293_v8  ;;  %v1050_v8 = vmul.f32 %v5389_v35, %v5443_v52  ;;  %v1044_v52 = vld [vmem:[#allocation17 + $0x8] sm:$0xff] }
 0x2e3   : > { %v1357_v61 = vpop.permute.xlu0 %1356 }
 0x2e4   : > { %v5616_v18 = vpack.c.bf16 %v1389_v13, %v1388_v24  ;;  %v1394_v59 = vadd.f32 %v1357_v61, %v1298_v10  ;;  %v1040_v13 = vld [vmem:[#allocation16 + $0x8] sm:$0xff]  ;;  %v1039_v10 = vld [vmem:[#allocation16] sm:$0xff] }
 0x2e5   : > { %v1359_v19 = vpop.permute.xlu1 %1358 }
 0x2e6   : > { %v1395_v26 = vadd.f32 %v1359_v19, %v1299_v29  ;;  %1576 = vrot.lane.b32.xlu1 %v5616_v18, %s4791_s28  ;;  %1938 = vrot.lane.b32.xlu0 %v5616_v18, %s4792_s4  ;;  %v1043_v29 = vld [vmem:[#allocation17] sm:$0xff] }
 0x2e7   : > { %v1353_v60 = vpop.permute.xlu0 %1352 }
 0x2e8   : > { %v5624_v49 = vpack.c.bf16 %v1395_v26, %v1394_v59  ;;  %v1392_v4 = vadd.f32 %v1353_v60, %v1296_v20 }
 0x2e9   : > { %v1355_v47 = vpop.permute.xlu1 %1354 }
 0x2ea   : > { %v1393_v45 = vadd.f32 %v1355_v47, %v1297_v21  ;;  %1578 = vrot.lane.b32.xlu1 %v5612_v11, %s4791_s28  ;;  %1940 = vrot.lane.b32.xlu0 %v5612_v11, %s4792_s4 }
 0x2eb   : > { %v1161_v42 = vpop.permute.xlu0 %1160 }
 0x2ec   : > { %v5634_v46 = vpack.c.bf16 %v1393_v45, %v1392_v4  ;;  %v1208_v0 = vsub.f32 %v1048_v5, %v1161_v42  ;;  %v6260_v42 = vsub.s32 0, %v5551_v55 }
 0x2ed   : > { %v1163_v30 = vpop.permute.xlu1 %1162 }
 0x2ee   : > { %v1209_v53 = vsub.f32 %v1049_v22, %v1163_v30  ;;  %1580 = vrot.lane.b32.xlu1 %v5634_v46, %s4791_s28  ;;  %1942 = vrot.lane.b32.xlu0 %v5634_v46, %s4792_s4 }
 0x2ef   : > { %v1165_v56 = vpop.permute.xlu0 %1164 }
 0x2f0   : > { %v5644_v6 = vpack.c.bf16 %v1209_v53, %v1208_v0  ;;  %v1210_v32 = vsub.f32 %v1050_v8, %v1165_v56  ;;  %v1052_v53 = vmul.f32 %v5397_v37, %v5486_v31 }
 0x2f1   : > { %v1167_v1 = vpop.permute.xlu1 %1166 }
 0x2f2   : > { %v1211_v3 = vsub.f32 %v1051_v33, %v1167_v1  ;;  %1582 = vrot.lane.b32.xlu1 %v5624_v49, %s4791_s28  ;;  %1944 = vrot.lane.b32.xlu0 %v5624_v49, %s4792_s4 }
 0x2f4   : > { %v5654_v14 = vpack.c.bf16 %v1211_v3, %v1210_v32  ;;  %v1054_v3 = vmul.f32 %v5405_v39, %v5471_v15 }
 0x2f6   : > { %1584 = vrot.lane.b32.xlu1 %v5604_v44, %s4791_s28  ;;  %1946 = vrot.lane.b32.xlu0 %v5604_v44, %s4792_s4 }
 0x2fa   : > { %1586 = vrot.lane.b32.xlu1 %v5592_v43, %s4791_s28  ;;  %1948 = vrot.lane.b32.xlu0 %v5592_v43, %s4792_s4 }
 0x2fe   : > { %2086 = vrot.lane.b32.xlu0 %v5654_v14, %s4793_s26  ;;  %2084 = vrot.lane.b32.xlu1 %v5644_v6, %s4793_s26 }
 0x300   : > { %v861_v34 = vpop.permute.xlu0 %860 }
 0x301   : > { %v977_v24 = vadd.f32 %v5528_v2, %v861_v34 }
 0x302   : > { %v866_v35 = vpop.permute.xlu1 %865 }
 0x303   : > { %v980_v58 = vadd.f32 %v5535_v9, %v866_v35  ;;  %v1400_v4 = vmul.f32 %v1043_v29, %v977_v24  ;;  %v1426_v45 = vmul.f32 %v1039_v10, %v977_v24  ;;  %v5675_v9 = vrot.slane %v5547_v17, %v6260_v42  ;;  %v856_v42 = vld [vmem:[#allocation11 + $0x30] sm:$0xff] }
 0x304   : > { %v886_v61 = vpop.permute.xlu0 %885  ;;  %v1055_v17 = vmul.f32 %v5403_v38, %v5479_v23 }
 0x305   : > { %v996_v19 = vadd.f32 %v5543_v50, %v886_v61  ;;  %v1401_v59 = vmul.f32 %v1044_v52, %v980_v58  ;;  %v1427_v60 = vmul.f32 %v1040_v13, %v980_v58  ;;  %v1053_v50 = vmul.f32 %v5395_v36, %v5489_v48  ;;  %v852_v61 = vld [vmem:[#allocation11 + $0x10] sm:$0xff] }
 0x306   : > { %v881_v26 = vpop.permute.xlu1 %880 }
 0x307   : > { %v1405_v20 = vmul.f32 %v1040_v13, %v996_v19  ;;  %v1423_v21 = vmul.f32 %v1044_v52, %v996_v19  ;;  %v993_v47 = vadd.f32 %v5539_v25, %v881_v26 }
 0x308   : > { %v1171_v2 = vpop.permute.xlu0 %1170 }
 0x309   : > { %v1409_v5 = vsub.f32 %v1401_v59, %v1405_v20  ;;  %v1431_v22 = vadd.f32 %v1427_v60, %v1423_v21  ;;  %v1404_v30 = vmul.f32 %v1039_v10, %v993_v47  ;;  %v1422_v0 = vmul.f32 %v1043_v29, %v993_v47  ;;  %v6261_v20 = vld [vmem:[#allocation37_spill] sm:$0xff]  ;;  %v6262_v47 = vld [vmem:[#allocation38_spill] sm:$0xff] }
 0x30a   : > { %v1169_v56 = vpop.permute.xlu1 %1168  ;;  %v1213_v33 = vsub.f32 %v1053_v50, %v1171_v2  ;;  %v1056_v29 = vmul.f32 %v5413_v41, %v5506_v57  ;;  %v1057_v59 = vmul.f32 %v5411_v40, %v5509_v16  ;;  %v1059_v41 = vmul.f32 %v6261_v20, %v5499_v51 }
 0x30b   : > { %v1408_v25 = vsub.f32 %v1400_v4, %v1404_v30  ;;  %v1430_v8 = vadd.f32 %v1426_v45, %v1422_v0  ;;  %v1212_v1 = vsub.f32 %v1052_v53, %v1169_v56  ;;  %v1419_v34 = vmul.f32 %v5675_v9, %v1409_v5  ;;  %v853_v45 = vld [vmem:[#allocation11 + $0x18] sm:$0xff] }
 0x30c   : > { %v1175_v32 = vpop.permute.xlu0 %1174  ;;  %v1435_v35 = vmul.f32 %v1431_v22, %v5675_v9  ;;  %v1058_v4 = vmul.f32 %v6262_v47, %v5491_v28  ;;  %v6263_v30 = vld [vmem:[#allocation39_spill] sm:$0xff]  ;;  %v6264_v28 = vld [vmem:[#allocation40_spill] sm:$0xff] }
 0x30d   : > { %v1418_v36 = vmul.f32 %v5675_v9, %v1408_v25  ;;  %v1434_v37 = vmul.f32 %v1430_v8, %v5675_v9  ;;  %v5689_v31 = vpack.c.bf16 %v1213_v33, %v1212_v1  ;;  %v1215_v52 = vsub.f32 %v1055_v17, %v1175_v32  ;;  %v857_v53 = vld [vmem:[#allocation11 + $0x38] sm:$0xff]  ;;  %v6265_v17 = vld [vmem:[#allocation41_spill] sm:$0xff] }
 0x30e   : > { %v1173_v48 = vpop.permute.xlu1 %1172  ;;  %v1061_v0 = vmul.f32 %v6263_v30, %v5469_v12  ;;  %v1060_v50 = vmul.f32 %v6264_v28, %v5464_v7  ;;  %v1063_v32 = vmul.f32 %v6265_v17, %v5451_v62 }
 0x30f   : > { %v1214_v58 = vsub.f32 %v1054_v3, %v1173_v48  ;;  %v1456_v24 = vpack.c.bf16 %v1435_v35, %v1434_v37  ;;  %v5691_v38 = vpack.c.bf16 %v1419_v34, %v1418_v36  ;;  %2088 = vrot.lane.b32.xlu1 %v5689_v31, %s4793_s26  ;;  %v6266_v3 = vld [vmem:[#allocation42_spill] sm:$0xff] }
 0x310   : > { %v1183_v39 = vpop.permute.xlu0 %1182  ;;  %v1062_v12 = vmul.f32 %v6266_v3, %v5445_v54 }
 0x311   : > { %v5695_v15 = vpack.c.bf16 %v1215_v52, %v1214_v58  ;;  %4153 = vmatprep.subr.msk.bf16.mxu1 %vm1613_vm1, %v1456_v24  ;;  %v1615_v23 = vsel %vm1613_vm1, %v1456_v24, 0  ;;  %v1951_v13 = vrot.slane %v1456_v24, 4  ;;  %v2101_v60 = vrot.slane %v5691_v38, 4 }
 0x312   : > { %v1177_v10 = vpop.permute.xlu1 %1176  ;;  %3942 = vmatpush3.bf16.msra.mxu1 %v1615_v23  ;;  %v1219_v16 = vsub.f32 %v1059_v41, %v1183_v39 }
 0x313   : > { %4154 = vmatprep.subr.msk.bf16.mxu1 %vm1613_vm1, %v5691_v38  ;;  %4155 = vmatprep.subr.msk.bf16.mxu0 %vm1613_vm1, %v1951_v13  ;;  %v1977_v19 = vsel %vm1613_vm1, %v1951_v13, 0  ;;  %v1216_v57 = vsub.f32 %v1056_v29, %v1177_v10  ;;  %v1045_v29 = vld [vmem:[#allocation17 + $0x10] sm:$0xff] }
 0x314   : > { %2090 = vrot.lane.b32.xlu0 %v5695_v15, %s4793_s26  ;;  %870 = vperm.xlu1 %4331, %v852_v61   ;;  %v1179_v26 = vpop.permute.xlu0 %1178 }
 0x315   : > { %3978 = vmatpush3.bf16.msra.mxu0 %v1977_v19  ;;  %v1217_v21 = vsub.f32 %v1057_v59, %v1179_v26  ;;  %v1041_v19 = vld [vmem:[#allocation16 + $0x10] sm:$0xff] }
 0x316   : > { %4156 = vmatprep.subr.msk.bf16.mxu0 %vm1613_vm1, %v2101_v60  ;;  %v1181_v40 = vpop.permute.xlu1 %1180 }
 0x317   : > { %v5717_v2 = vpack.c.bf16 %v1217_v21, %v1216_v57  ;;  %v1218_v5 = vsub.f32 %v1058_v4, %v1181_v40  ;;  %v6269_v21 = vld [vmem:[#allocation44_spill] sm:$0xff] }
 0x318   : > { %875 = vperm.xlu0 %4330, %v853_v45   ;;  %890 = vperm.xlu1 %4331, %v856_v42   ;;  %v1187_v51 = vpop.permute.xlu0 %1186  ;;  %v1042_v42 = vld [vmem:[#allocation16 + $0x18] sm:$0xff] }
 0x319   : > { %v5719_v22 = vpack.c.bf16 %v1219_v16, %v1218_v5  ;;  %v1221_v25 = vsub.f32 %v1061_v0, %v1187_v51  ;;  %v1046_v40 = vld [vmem:[#allocation17 + $0x18] sm:$0xff] }
 0x31a   : > { %v1185_v56 = vpop.permute.xlu1 %1184 }
 0x31b   : > { %v1220_v8 = vsub.f32 %v1060_v50, %v1185_v56 }
 0x31c   : > { %895 = vperm.xlu0 %4330, %v857_v53   ;;  %2092 = vrot.lane.b32.xlu1 %v5717_v2, %s4793_s26  ;;  %v1191_v33 = vpop.permute.xlu0 %1190 }
 0x31d   : > { %v5727_v1 = vpack.c.bf16 %v1221_v25, %v1220_v8  ;;  %v1223_v35 = vsub.f32 %v1063_v32, %v1191_v33 }
 0x31e   : > { %v1189_v34 = vpop.permute.xlu1 %1188 }
 0x31f   : > { %v1222_v7 = vsub.f32 %v1062_v12, %v1189_v34 }
 0x320   : > { %2094 = vrot.lane.b32.xlu0 %v5719_v22, %s4793_s26  ;;  %2096 = vrot.lane.b32.xlu1 %v5727_v1, %s4793_s26 }
 0x321   : > { %v5737_v36 = vpack.c.bf16 %v1223_v35, %v1222_v7 }
 0x324   : > { %2098 = vrot.lane.b32.xlu0 %v5737_v36, %s4793_s26  ;;  %2323 = vrot.lane.b32.xlu1 %v5596_v27, %s4794_s7 }
 0x328   : > { %2700 = vrot.lane.b32.xlu0 %v5596_v27, %s4795_s16  ;;  %2325 = vrot.lane.b32.xlu1 %v5590_v63, %s4794_s7  ;;  %v1739_v27 = vsel %vm1613_vm1, %v5691_v38, 0 }
 0x32c   : > { %2702 = vrot.lane.b32.xlu0 %v5590_v63, %s4795_s16  ;;  %2327 = vrot.lane.b32.xlu1 %v5616_v18, %s4794_s7 }
 0x330   : > { %2704 = vrot.lane.b32.xlu0 %v5616_v18, %s4795_s16  ;;  %2329 = vrot.lane.b32.xlu1 %v5612_v11, %s4794_s7 }
 0x334   : > { %2706 = vrot.lane.b32.xlu0 %v5612_v11, %s4795_s16  ;;  %2331 = vrot.lane.b32.xlu1 %v5634_v46, %s4794_s7 }
 0x338   : > { %2708 = vrot.lane.b32.xlu0 %v5634_v46, %s4795_s16  ;;  %2333 = vrot.lane.b32.xlu1 %v5624_v49, %s4794_s7 }
 0x33c   : > { %2710 = vrot.lane.b32.xlu0 %v5624_v49, %s4795_s16  ;;  %2335 = vrot.lane.b32.xlu1 %v5604_v44, %s4794_s7 }
 0x340   : > { %2712 = vrot.lane.b32.xlu0 %v5604_v44, %s4795_s16  ;;  %2337 = vrot.lane.b32.xlu1 %v5592_v43, %s4794_s7  ;;  %v2127_v44 = vsel %vm1613_vm1, %v2101_v60, 0  ;;  %v6268_v60 = vld [vmem:[#allocation45_spill] sm:$0xff] }
 0x344   : > { %2714 = vrot.lane.b32.xlu0 %v5592_v43, %s4795_s16  ;;  %2463 = vrot.lane.b32.xlu1 %v5644_v6, %s4796_s19 }
 0x348   : > { %2842 = vrot.lane.b32.xlu0 %v5644_v6, %s4797_s17  ;;  %2465 = vrot.lane.b32.xlu1 %v5654_v14, %s4796_s19 }
 0x34c   : > { %2844 = vrot.lane.b32.xlu0 %v5654_v14, %s4797_s17  ;;  %2467 = vrot.lane.b32.xlu1 %v5689_v31, %s4796_s19  ;;  %v1573_v54 = vpop.permute.xlu1 %1572  ;;  %v1935_v43 = vpop.permute.xlu0 %1934 }
 0x34d   : > { %3943 = vmatprep.mubr.msk.bf16.mxu1 %vm1588_vm2, %v1573_v54  ;;  %3979 = vmatprep.mubr.msk.bf16.mxu0 %vm1588_vm2, %v1935_v43 }
 0x350   : > { %2846 = vrot.lane.b32.xlu0 %v5689_v31, %s4797_s17  ;;  %2469 = vrot.lane.b32.xlu1 %v5695_v15, %s4796_s19  ;;  %v1575_v62 = vpop.permute.xlu1 %1574  ;;  %v1937_v63 = vpop.permute.xlu0 %1936 }
 0x351   : > { %3944 = vmatmul.mubr.msk.bf16.vlgmr.msra.gmra.mrb[12].mxu1 %vm1588_vm2, %v1575_v62  ;;  %3980 = vmatmul.mubr.msk.bf16.vlgmr.msra.gmra.mrb[12].mxu0 %vm1588_vm2, %v1937_v63 }
 0x352   : > { %3960 = vmatpush3.bf16.msra.mxu1 %v1739_v27  ;;  %3996 = vmatpush3.bf16.msra.mxu0 %v2127_v44 }
 0x354   : > { %2848 = vrot.lane.b32.xlu0 %v5695_v15, %s4797_s17  ;;  %2471 = vrot.lane.b32.xlu1 %v5717_v2, %s4796_s19 }
 0x358   : > { %2850 = vrot.lane.b32.xlu0 %v5717_v2, %s4797_s17  ;;  %2473 = vrot.lane.b32.xlu1 %v5719_v22, %s4796_s19  ;;  %v1577_v11 = vpop.permute.xlu1 %1576  ;;  %v1939_v18 = vpop.permute.xlu0 %1938 }
 0x359   : > { %3947 = vmatprep.mubr.msk.bf16.mxu1 %vm1588_vm2, %v1577_v11  ;;  %3983 = vmatprep.mubr.msk.bf16.mxu0 %vm1588_vm2, %v1939_v18 }
 0x35c   : > { %2852 = vrot.lane.b32.xlu0 %v5719_v22, %s4797_s17  ;;  %2475 = vrot.lane.b32.xlu1 %v5727_v1, %s4796_s19  ;;  %v1579_v49 = vpop.permute.xlu1 %1578  ;;  %v1941_v46 = vpop.permute.xlu0 %1940 }
 0x35d   : > { %3948 = vmatmul.mubr.msk.bf16.gmra.mrb[16].mxu1 %vm1588_vm2, %v1579_v49  ;;  %3984 = vmatmul.mubr.msk.bf16.gmra.mrb[16].mxu0 %vm1588_vm2, %v1941_v46 }
 0x360   : > { %2854 = vrot.lane.b32.xlu0 %v5727_v1, %s4797_s17  ;;  %2477 = vrot.lane.b32.xlu1 %v5737_v36, %s4796_s19  ;;  %v1581_v37 = vpop.permute.xlu1 %1580  ;;  %v1943_v48 = vpop.permute.xlu0 %1942 }
 0x361   : > { %3951 = vmatprep.mubr.msk.bf16.mxu1 %vm1588_vm2, %v1581_v37  ;;  %3987 = vmatprep.mubr.msk.bf16.mxu0 %vm1588_vm2, %v1943_v48 }
 0x364   : > { %2856 = vrot.lane.b32.xlu0 %v5737_v36, %s4797_s17  ;;  %v1583_v52 = vpop.permute.xlu1 %1582  ;;  %v1945_v58 = vpop.permute.xlu0 %1944 }
 0x365   : > { %3952 = vmatmul.mubr.msk.bf16.gmra.mrb[20].mxu1 %vm1588_vm2, %v1583_v52  ;;  %3988 = vmatmul.mubr.msk.bf16.gmra.mrb[20].mxu0 %vm1588_vm2, %v1945_v58 }
 0x368   : > { %v1585_v24 = vpop.permute.xlu1 %1584  ;;  %v1947_v38 = vpop.permute.xlu0 %1946 }
 0x369   : > { %3955 = vmatprep.mubr.msk.bf16.mxu1 %vm1588_vm2, %v1585_v24  ;;  %3991 = vmatprep.mubr.msk.bf16.mxu0 %vm1588_vm2, %v1947_v38 }
 0x36c   : > { %v1587_v39 = vpop.permute.xlu1 %1586  ;;  %v1949_v23 = vpop.permute.xlu0 %1948 }
 0x36d   : > { %3956 = vmatmul.mubr.msk.bf16.gmra.mrb[24].mxu1 %vm1588_vm2, %v1587_v39  ;;  %3992 = vmatmul.mubr.msk.bf16.gmra.mrb[24].mxu0 %vm1588_vm2, %v1949_v23 }
 0x36e   : > { %3961 = vmatprep.mubr.msk.bf16.mxu1 %vm1588_vm2, %v5644_v6 }
 0x370   : > { %v2085_v13 = vpop.permute.xlu1 %2084  ;;  %v2087_v61 = vpop.permute.xlu0 %2086 }
 0x371   : > { %3997 = vmatprep.mubr.msk.bf16.mxu0 %vm1588_vm2, %v2085_v13 }
 0x375   : > { %3962 = vmatmul.mubr.msk.bf16.vlgmr.msra.gmra.mrb[12].mxu1 %vm1588_vm2, %v5654_v14  ;;  %3998 = vmatmul.mubr.msk.bf16.vlgmr.msra.gmra.mrb[12].mxu0 %vm1588_vm2, %v2087_v61 }
 0x376   : > { %3965 = vmatprep.mubr.msk.bf16.mxu1 %vm1588_vm2, %v5689_v31  ;;  %v6267_v31 = vld [vmem:[#allocation43_spill] sm:$0xff] }
 0x37d   : > { %3966 = vmatmul.mubr.msk.bf16.gmra.mrb[16].mxu1 %vm1588_vm2, %v5695_v15 }
 0x37e   : > { %3969 = vmatprep.mubr.msk.bf16.mxu1 %vm1588_vm2, %v5717_v2 }
 0x381   : > { %v2089_v10 = vpop.permute.xlu1 %2088 }
 0x382   : > { %4001 = vmatprep.mubr.msk.bf16.mxu0 %vm1588_vm2, %v2089_v10 }
 0x385   : > { %3970 = vmatmul.mubr.msk.bf16.gmra.mrb[20].mxu1 %vm1588_vm2, %v5719_v22  ;;  %v6270_v22 = vld [vmem:[#allocation46_spill] sm:$0xff] }
 0x386   : > { %v2091_v6 = vpop.permute.xlu0 %2090  ;;  %3973 = vmatprep.mubr.msk.bf16.mxu1 %vm1588_vm2, %v5727_v1 }
 0x387   : > { %4002 = vmatmul.mubr.msk.bf16.gmra.mrb[16].mxu0 %vm1588_vm2, %v2091_v6 }
 0x38d   : > { %3974 = vmatmul.mubr.msk.bf16.gmra.mrb[24].mxu1 %vm1588_vm2, %v5737_v36 }
 0x393   : > { %v871_v14 = vpop.permute.xlu1 %870 }
 0x394   : > { %v985_v15 = vadd.f32 %v6267_v31, %v871_v14 }
 0x396   : > { %v1402_v41 = vmul.f32 %v1045_v29, %v985_v15  ;;  %v1428_v57 = vmul.f32 %v1041_v19, %v985_v15 }
 0x397   : > { %v876_v59 = vpop.permute.xlu0 %875  ;;  %v891_v26 = vpop.permute.xlu1 %890 }
 0x398   : > { %v1001_v20 = vadd.f32 %v6268_v60, %v891_v26  ;;  %v988_v47 = vadd.f32 %v6269_v21, %v876_v59 }
 0x39a   : > { %v1406_v4 = vmul.f32 %v1041_v19, %v1001_v20  ;;  %v1424_v45 = vmul.f32 %v1045_v29, %v1001_v20  ;;  %v1403_v0 = vmul.f32 %v1046_v40, %v988_v47  ;;  %v1429_v28 = vmul.f32 %v1042_v42, %v988_v47 }
 0x39b   : > { %v896_v16 = vpop.permute.xlu0 %895  ;;  %v2093_v2 = vpop.permute.xlu1 %2092 }
 0x39c   : > { %v1410_v5 = vsub.f32 %v1402_v41, %v1406_v4  ;;  %v1432_v51 = vadd.f32 %v1428_v57, %v1424_v45  ;;  %v1004_v30 = vadd.f32 %v6270_v22, %v896_v16  ;;  %4005 = vmatprep.mubr.msk.bf16.mxu0 %vm1588_vm2, %v2093_v2  ;;  %v1461_v4 = vadd.s32 16, %v5551_v55 }
 0x39d   : > { %v6271_v45 = vlaneseq  ;;  %v1460_v16 = vadd.s32 8, %v5551_v55  ;;  %v1465_v2 = vadd.s32 48, %v5551_v55 }
 0x39e   : > { %v1407_v50 = vmul.f32 %v1042_v42, %v1004_v30  ;;  %v1425_v53 = vmul.f32 %v1046_v40, %v1004_v30  ;;  %v1420_v1 = vmul.f32 %v5675_v9, %v1410_v5  ;;  %v1436_v17 = vmul.f32 %v1432_v51, %v5675_v9 }
 0x39f   : > { %v2095_v56 = vpop.permute.xlu0 %2094  ;;  %v2097_v25 = vpop.permute.xlu1 %2096  ;;  %v5884_v42 = vand.u32 127, %v6271_v45  ;;  %v1462_v40 = vadd.s32 24, %v5551_v55  ;;  %v1463_v5 = vadd.s32 32, %v5551_v55  ;;  %v4798_v51 = vmov 0.0  }
 0x3a0   : > { %v1411_v8 = vsub.f32 %v1403_v0, %v1407_v50  ;;  %v1433_v33 = vadd.f32 %v1429_v28, %v1425_v53  ;;  %4006 = vmatmul.mubr.msk.bf16.gmra.mrb[20].mxu0 %vm1588_vm2, %v2095_v56  ;;  %v1466_v0 = vadd.s32 56, %v5551_v55  ;;  %v1464_v28 = vadd.s32 40, %v5551_v55  ;;  %v6272_v56 = vld [vmem:[#allocation47_spill] sm:$0xff] }
 0x3a1   : > { %4009 = vmatprep.mubr.msk.bf16.mxu0 %vm1588_vm2, %v2097_v25  ;;  %vm1479_vm3 = vcmp.gt.s32.totalorder %v1461_v4, %v5884_v42  ;;  %vm1480_vm4 = vcmp.gt.s32.totalorder %v1462_v40, %v5884_v42  ;;  %vm1477_vm5 = vcmp.gt.s32.totalorder %v5551_v55, %v5884_v42  ;;  %vm1478_vm6 = vcmp.gt.s32.totalorder %v1460_v16, %v5884_v42 }
 0x3a2   : > { %v1421_v32 = vmul.f32 %v5675_v9, %v1411_v8  ;;  %v1437_v3 = vmul.f32 %v1433_v33, %v5675_v9  ;;  %v3368_v22 = vsel %vm1479_vm3, 1.0, %v4798_v51  ;;  %v3369_v30 = vsel %vm1480_vm4, 1.0, %v4798_v51 }
 0x3a3   : > { %v2099_v12 = vpop.permute.xlu0 %2098  ;;  %v2324_v34 = vpop.permute.xlu1 %2323  ;;  %v3366_v50 = vsel %vm1477_vm5, 1.0, %v4798_v51  ;;  %v3367_v53 = vsel %vm1478_vm6, 1.0, %v4798_v51  ;;  %v1534_v25 = vadd.f32 %v3368_v22, %v6272_v56  ;;  %v1535_v8 = vadd.f32 %v3369_v30, %v6272_v56 }
 0x3a4   : > { %4015 = vmatprep.mubr.msk.bf16.mxu1 %vm1588_vm2, %v2324_v34  ;;  %v1457_v35 = vpack.c.bf16 %v1437_v3, %v1436_v17  ;;  %v1455_v7 = vpack.c.bf16 %v1421_v32, %v1420_v1  ;;  %vm1483_vm7 = vcmp.gt.s32.totalorder %v1465_v2, %v5884_v42  ;;  %vm1481_vm8 = vcmp.gt.s32.totalorder %v1463_v5, %v5884_v42 }
 0x3a5   : > { %v1532_v33 = vadd.f32 %v3366_v50, %v6272_v56  ;;  %v1533_v1 = vadd.f32 %v3367_v53, %v6272_v56  ;;  %vm1484_vm9 = vcmp.gt.s32.totalorder %v1466_v0, %v5884_v42  ;;  %vm1482_vm10 = vcmp.gt.s32.totalorder %v1464_v28, %v5884_v42 }
 0x3a6   : > { %4157 = vmatprep.subr.msk.bf16.mxu1 %vm1613_vm1, %v1457_v35  ;;  %v2364_v36 = vsel %vm1613_vm1, %v1457_v35, 0  ;;  %v2717_v54 = vrot.slane %v1457_v35, 4  ;;  %v2859_v63 = vrot.slane %v1455_v7, 4  ;;  %v2504_v27 = vsel %vm1613_vm1, %v1455_v7, 0 }
 0x3a7   : > { %v2701_v43 = vpop.permute.xlu0 %2700  ;;  %v2326_v62 = vpop.permute.xlu1 %2325  ;;  %4014 = vmatpush3.bf16.msra.mxu1 %v2364_v36  ;;  %v3372_v17 = vsel %vm1483_vm7, 1.0, %v4798_v51  ;;  %v3370_v32 = vsel %vm1481_vm8, 1.0, %v4798_v51  ;;  %v1469_v3 = vadd.s32 80, %v5551_v55  ;;  %v5914_v34 = vmul.f32 2.5e+11, %v1535_v8 }
 0x3a8   : > { %4010 = vmatmul.mubr.msk.bf16.gmra.mrb[24].mxu0 %vm1588_vm2, %v2099_v12  ;;  %4158 = vmatprep.subr.msk.bf16.mxu1 %vm1613_vm1, %v1455_v7  ;;  %v2743_v9 = vsel %vm1613_vm1, %v2717_v54, 0  ;;  %v2885_v46 = vsel %vm1613_vm1, %v2859_v63, 0  ;;  %v5912_v12 = vmul.f32 2.5e+11, %v1534_v25  ;;  %v3373_v35 = vsel %vm1484_vm9, 1.0, %v4798_v51 }
 0x3a9   : > { %4159 = vmatprep.subr.msk.bf16.mxu0 %vm1613_vm1, %v2717_v54  ;;  %4051 = vmatprep.mubr.msk.bf16.mxu0 %vm1588_vm2, %v2701_v43  ;;  %v3371_v7 = vsel %vm1482_vm10, 1.0, %v4798_v51  ;;  %v5918_v43 = vmul.f32 2.5e+11, %v1532_v33  ;;  %vm1487_vm11 = vcmp.gt.s32.totalorder %v1469_v3, %v5884_v42  ;;  %v1473_v40 = vadd.s32 112, %v5551_v55 }
 0x3aa   : > { %4050 = vmatpush3.bf16.msra.mxu0 %v2743_v9  ;;  %4016 = vmatmul.mubr.msk.bf16.vlgmr.msra.gmra.mrb[28].mxu1 %vm1588_vm2, %v2326_v62  ;;  %v5920_v62 = vmul.f32 2.5e+11, %v1533_v1  ;;  %v1474_v16 = vadd.s32 120, %v5551_v55  ;;  %v1471_v22 = vadd.s32 96, %v5551_v55  ;;  %v1472_v30 = vadd.s32 104, %v5551_v55 }
 0x3ab   : > { %4160 = vmatprep.subr.msk.bf16.mxu0 %vm1613_vm1, %v2859_v63  ;;  %v2703_v44 = vpop.permute.xlu0 %2702  ;;  %v2328_v11 = vpop.permute.xlu1 %2327  ;;  %4032 = vmatpush3.bf16.msra.mxu1 %v2504_v27  ;;  %v1538_v27 = vadd.f32 %v3372_v17, %v6272_v56  ;;  %vm1491_vm15 = vcmp.gt.s32.totalorder %v1473_v40, %v5884_v42 }
 0x3ac   : > { %4019 = vmatprep.mubr.msk.bf16.mxu1 %vm1588_vm2, %v2328_v11  ;;  %v1467_v11 = vadd.s32 64, %v5551_v55  ;;  %vm1492_vm0 = vcmp.gt.s32.totalorder %v1474_v16, %v5884_v42  ;;  %vm1489_vm1 = vcmp.gt.s32.totalorder %v1471_v22, %v5884_v42 }
 0x3ae   : > { %vm1485_vm12 = vcmp.gt.s32.totalorder %v1467_v11, %v5884_v42 }
 0x3af   : > { %v2705_v18 = vpop.permute.xlu0 %2704  ;;  %v2330_v49 = vpop.permute.xlu1 %2329 }
 0x3b0   : > { %4052 = vmatmul.mubr.msk.bf16.vlgmr.msra.gmra.mrb[28].mxu0 %vm1588_vm2, %v2703_v44  ;;  %v1536_v44 = vadd.f32 %v3370_v32, %v6272_v56 }
 0x3b1   : > { %4068 = vmatpush3.bf16.msra.mxu0 %v2885_v46  ;;  %4055 = vmatprep.mubr.msk.bf16.mxu0 %vm1588_vm2, %v2705_v18  ;;  %v1470_v18 = vadd.s32 88, %v5551_v55 }
 0x3b2   : > { %4020 = vmatmul.mubr.msk.bf16.gmra.mrb[32].mxu1 %vm1588_vm2, %v2330_v49 }
 0x3b3   : > { %v2707_v37 = vpop.permute.xlu0 %2706  ;;  %v2332_v48 = vpop.permute.xlu1 %2331  ;;  %vm1488_vm13 = vcmp.gt.s32.totalorder %v1470_v18, %v5884_v42 }
 0x3b4   : > { %4023 = vmatprep.mubr.msk.bf16.mxu1 %vm1588_vm2, %v2332_v48  ;;  %v1537_v48 = vadd.f32 %v3371_v7, %v6272_v56 }
 0x3b7   : > { %v2709_v52 = vpop.permute.xlu0 %2708  ;;  %v2334_v58 = vpop.permute.xlu1 %2333 }
 0x3b8   : > { %4056 = vmatmul.mubr.msk.bf16.gmra.mrb[32].mxu0 %vm1588_vm2, %v2707_v37  ;;  %v1539_v37 = vadd.f32 %v3373_v35, %v6272_v56 }
 0x3b9   : > { %4059 = vmatprep.mubr.msk.bf16.mxu0 %vm1588_vm2, %v2709_v52  ;;  %v1468_v52 = vadd.s32 72, %v5551_v55 }
 0x3ba   : > { %4024 = vmatmul.mubr.msk.bf16.gmra.mrb[36].mxu1 %vm1588_vm2, %v2334_v58 }
 0x3bb   : > { %v2711_v24 = vpop.permute.xlu0 %2710  ;;  %v2336_v38 = vpop.permute.xlu1 %2335  ;;  %vm1486_vm14 = vcmp.gt.s32.totalorder %v1468_v52, %v5884_v42 }
 0x3bc   : > { %4027 = vmatprep.mubr.msk.bf16.mxu1 %vm1588_vm2, %v2336_v38  ;;  %v3375_v45 = vsel %vm1486_vm14, 1.0, %v4798_v51 }
 0x3bd   : > { %v1541_v1 = vadd.f32 %v3375_v45, %v6272_v56 }
 0x3bf   : > { %v2713_v39 = vpop.permute.xlu0 %2712  ;;  %v2338_v23 = vpop.permute.xlu1 %2337 }
 0x3c0   : > { %4060 = vmatmul.mubr.msk.bf16.gmra.mrb[36].mxu0 %vm1588_vm2, %v2711_v24 }
 0x3c1   : > { %4063 = vmatprep.mubr.msk.bf16.mxu0 %vm1588_vm2, %v2713_v39 }
 0x3c2   : > { %4028 = vmatmul.mubr.msk.bf16.gmra.mrb[40].mxu1 %vm1588_vm2, %v2338_v23 }
 0x3c3   : > { %v2715_v13 = vpop.permute.xlu0 %2714  ;;  %v2464_v61 = vpop.permute.xlu1 %2463 }
 0x3c4   : > { %4033 = vmatprep.mubr.msk.bf16.mxu1 %vm1588_vm2, %v2464_v61 }
 0x3c7   : > { %v2843_v10 = vpop.permute.xlu0 %2842  ;;  %v2466_v6 = vpop.permute.xlu1 %2465 }
 0x3c8   : > { %4064 = vmatmul.mubr.msk.bf16.gmra.mrb[40].mxu0 %vm1588_vm2, %v2715_v13 }
 0x3c9   : > { %4069 = vmatprep.mubr.msk.bf16.mxu0 %vm1588_vm2, %v2843_v10 }
 0x3ca   : > { %4034 = vmatmul.mubr.msk.bf16.vlgmr.msra.gmra.mrb[28].mxu1 %vm1588_vm2, %v2466_v6 }
 0x3cb   : > { %v2845_v14 = vpop.permute.xlu0 %2844  ;;  %v2468_v31 = vpop.permute.xlu1 %2467 }
 0x3cc   : > { %4037 = vmatprep.mubr.msk.bf16.mxu1 %vm1588_vm2, %v2468_v31 }
 0x3cf   : > { %v2847_v15 = vpop.permute.xlu0 %2846  ;;  %v2470_v29 = vpop.permute.xlu1 %2469 }
 0x3d0   : > { %4070 = vmatmul.mubr.msk.bf16.vlgmr.msra.gmra.mrb[28].mxu0 %vm1588_vm2, %v2845_v14 }
 0x3d1   : > { %4073 = vmatprep.mubr.msk.bf16.mxu0 %vm1588_vm2, %v2847_v15 }
 0x3d2   : > { %4038 = vmatmul.mubr.msk.bf16.gmra.mrb[32].mxu1 %vm1588_vm2, %v2470_v29 }
 0x3d3   : > { %v2849_v19 = vpop.permute.xlu0 %2848  ;;  %v2472_v59 = vpop.permute.xlu1 %2471 }
 0x3d4   : > { %4041 = vmatprep.mubr.msk.bf16.mxu1 %vm1588_vm2, %v2472_v59  ;;  %v5941_v59 = vmul.f32 2.5e+11, %v1538_v27  ;;  %v3378_v27 = vsel %vm1489_vm1, 1.0, %v4798_v51 }
 0x3d7   : > { %v2851_v26 = vpop.permute.xlu0 %2850  ;;  %v2474_v60 = vpop.permute.xlu1 %2473 }
 0x3d8   : > { %4074 = vmatmul.mubr.msk.bf16.gmra.mrb[32].mxu0 %vm1588_vm2, %v2849_v19 }
 0x3d9   : > { %4077 = vmatprep.mubr.msk.bf16.mxu0 %vm1588_vm2, %v2851_v26  ;;  %v5948_v26 = vmul.f32 2.5e+11, %v1536_v44 }
 0x3da   : > { %4042 = vmatmul.mubr.msk.bf16.gmra.mrb[36].mxu1 %vm1588_vm2, %v2474_v60  ;;  %v5950_v60 = vmul.f32 2.5e+11, %v1539_v37 }
 0x3db   : > { %v2853_v20 = vpop.permute.xlu0 %2852  ;;  %v2476_v41 = vpop.permute.xlu1 %2475 }
 0x3dc   : > { %4045 = vmatprep.mubr.msk.bf16.mxu1 %vm1588_vm2, %v2476_v41 }
 0x3df   : > { %v2855_v57 = vpop.permute.xlu0 %2854  ;;  %v2478_v21 = vpop.permute.xlu1 %2477 }
 0x3e0   : > { %4078 = vmatmul.mubr.msk.bf16.gmra.mrb[36].mxu0 %vm1588_vm2, %v2853_v20  ;;  %v3376_v20 = vsel %vm1487_vm11, 1.0, %v4798_v51 }
 0x3e1   : > { %4081 = vmatprep.mubr.msk.bf16.mxu0 %vm1588_vm2, %v2855_v57  ;;  %v5957_v57 = vmul.f32 2.5e+11, %v1537_v48  ;;  %v1542_v5 = vadd.f32 %v3376_v20, %v6272_v56 }
 0x3e2   : > { %4046 = vmatmul.mubr.msk.bf16.gmra.mrb[40].mxu1 %vm1588_vm2, %v2478_v21  ;;  %v3374_v21 = vsel %vm1485_vm12, 1.0, %v4798_v51 }
 0x3e3   : > { %v2857_v47 = vpop.permute.xlu0 %2856  ;;  %v1540_v53 = vadd.f32 %v3374_v21, %v6272_v56  ;;  %v5983_v32 = vmul.f32 2.5e+11, %v1542_v5 }
 0x3e5   : > { %v5985_v3 = vmul.f32 2.5e+11, %v1540_v53 }
 0x3e8   : > { %4082 = vmatmul.mubr.msk.bf16.gmra.mrb[40].mxu0 %vm1588_vm2, %v2857_v47  ;;  %v3377_v47 = vsel %vm1488_vm13, 1.0, %v4798_v51  ;;  %vm1490_vm2 = vcmp.gt.s32.totalorder %v1472_v30, %v5884_v42 }
 0x3e9   : > { %v1543_v25 = vadd.f32 %v3377_v47, %v6272_v56  ;;  %v3379_v42 = vsel %vm1490_vm2, 1.0, %v4798_v51 }
 0x3eb   : > { %v5987_v35 = vmul.f32 2.5e+11, %v1543_v25 }
 0x448   : > { %v3963_v36 = vpop.f32.mrb[12].mxu1  ;;  %v3999_v54 = vpop.f32.mrb[12].mxu0 }
 0x449   : > { %v1775_v9 = vpop.f32.mrb[13].mxu1  ;;  %v2163_v63 = vpop.f32.mrb[13].mxu0  ;;  %v1840_v58 = vsub.f32 %v3963_v36, %v5912_v12  ;;  %v2228_v24 = vsub.f32 %v3999_v54, %v5912_v12  ;;  %v5990_v36 = vmul.f32 2.5e+11, %v1541_v1  ;;  %v3380_v54 = vsel %vm1491_vm15, 1.0, %v4798_v51 }
 0x44a   : > { %v3964_v49 = vpop.f32.mrb[14].mxu1  ;;  %v4000_v46 = vpop.f32.mrb[14].mxu0  ;;  %v1838_v61 = vsub.f32 %v1775_v9, %v5918_v43  ;;  %v2226_v10 = vsub.f32 %v2163_v63, %v5918_v43  ;;  %v3381_v9 = vsel %vm1492_vm0, 1.0, %v4798_v51  ;;  %v1546_v48 = vadd.f32 %v3380_v54, %v6272_v56 }
 0x44b   : > { %v1841_v38 = vsub.f32 %v3964_v49, %v5914_v34  ;;  %v2229_v39 = vsub.f32 %v4000_v46, %v5914_v34  ;;  %v1778_v23 = vpop.f32.mrb[15].mxu1  ;;  %v2166_v13 = vpop.f32.mrb[15].mxu0  ;;  %v1547_v52 = vadd.f32 %v3381_v9, %v6272_v56  ;;  %v1544_v51 = vadd.f32 %v3378_v27, %v6272_v56 }
 0x44c   : > { %v1839_v6 = vsub.f32 %v1778_v23, %v5920_v62  ;;  %v2227_v14 = vsub.f32 %v2166_v13, %v5920_v62 }
 0x44d   : > { %v3638_v31 = vpack.c.bf16 %v1841_v38, %v1840_v58  ;;  %v3678_v15 = vpack.c.bf16 %v2229_v39, %v2228_v24  ;;  %v1545_v39 = vadd.f32 %v3379_v42, %v6272_v56 }
 0x44e   : > { %v3633_v29 = vpack.c.bf16 %v1839_v6, %v1838_v61  ;;  %v3673_v19 = vpack.c.bf16 %v2227_v14, %v2226_v10 }
 0x44f   : > { %3790 = vst [vmem:[%s5944_s13 + $0x8] sm:$0xff] %v3638_v31   ;;  %3798 = vst [vmem:[%s5944_s13 + $0x48] sm:$0xff] %v3678_v15   ;;  %v6016_v21 = vmul.f32 2.5e+11, %v1545_v39 }
 0x450   : > { %3634 = vst [vmem:[%s5944_s13] sm:$0xff] %v3633_v29   ;;  %3797 = vst [vmem:[%s5944_s13 + $0x40] sm:$0xff] %v3673_v19   ;;  %v3967_v41 = vpop.f32.mrb[16].mxu1  ;;  %v6009_v29 = vmul.f32 2.5e+11, %v1546_v48  ;;  %v6011_v19 = vmul.f32 2.5e+11, %v1547_v52 }
 0x451   : > { %v1791_v4 = vpop.f32.mrb[17].mxu1  ;;  %v1844_v0 = vsub.f32 %v3967_v41, %v5941_v59  ;;  %v6014_v41 = vmul.f32 2.5e+11, %v1544_v51 }
 0x452   : > { %v3968_v2 = vpop.f32.mrb[18].mxu1  ;;  %v1842_v8 = vsub.f32 %v1791_v4, %v5948_v26 }
 0x453   : > { %v1845_v28 = vsub.f32 %v3968_v2, %v5950_v60  ;;  %v1794_v50 = vpop.f32.mrb[19].mxu1 }
 0x454   : > { %v1843_v33 = vsub.f32 %v1794_v50, %v5957_v57 }
 0x455   : > { %v3648_v17 = vpack.c.bf16 %v1845_v28, %v1844_v0 }
 0x456   : > { %v3643_v55 = vpack.c.bf16 %v1843_v33, %v1842_v8 }
 0x457   : > { %3792 = vst [vmem:[%s5944_s13 + $0x18] sm:$0xff] %v3648_v17  }
 0x458   : > { %3791 = vst [vmem:[%s5944_s13 + $0x10] sm:$0xff] %v3643_v55   ;;  %v3971_v7 = vpop.f32.mrb[20].mxu1 }
 0x459   : > { %v1807_v63 = vpop.f32.mrb[21].mxu1  ;;  %v1848_v18 = vsub.f32 %v3971_v7, %v5983_v32 }
 0x45a   : > { %v4003_v44 = vpop.f32.mrb[16].mxu0  ;;  %v3972_v11 = vpop.f32.mrb[22].mxu1  ;;  %v1846_v58 = vsub.f32 %v1807_v63, %v5985_v3 }
 0x45b   : > { %v1849_v49 = vsub.f32 %v3972_v11, %v5987_v35  ;;  %v2179_v46 = vpop.f32.mrb[17].mxu0  ;;  %v1810_v37 = vpop.f32.mrb[23].mxu1  ;;  %v2232_v23 = vsub.f32 %v4003_v44, %v5941_v59 }
 0x45c   : > { %v1847_v24 = vsub.f32 %v1810_v37, %v5990_v36  ;;  %v4004_v38 = vpop.f32.mrb[18].mxu0  ;;  %v2230_v6 = vsub.f32 %v2179_v46, %v5948_v26 }
 0x45d   : > { %v3658_v13 = vpack.c.bf16 %v1849_v49, %v1848_v18  ;;  %v2233_v61 = vsub.f32 %v4004_v38, %v5950_v60  ;;  %v2182_v10 = vpop.f32.mrb[19].mxu0 }
 0x45e   : > { %v3653_v14 = vpack.c.bf16 %v1847_v24, %v1846_v58  ;;  %v2231_v31 = vsub.f32 %v2182_v10, %v5957_v57 }
 0x45f   : > { %3794 = vst [vmem:[%s5944_s13 + $0x28] sm:$0xff] %v3658_v13   ;;  %v3688_v15 = vpack.c.bf16 %v2233_v61, %v2232_v23 }
 0x460   : > { %3793 = vst [vmem:[%s5944_s13 + $0x20] sm:$0xff] %v3653_v14   ;;  %v3683_v56 = vpack.c.bf16 %v2231_v31, %v2230_v6  ;;  %v3975_v20 = vpop.f32.mrb[24].mxu1 }
 0x461   : > { %3800 = vst [vmem:[%s5944_s13 + $0x58] sm:$0xff] %v3688_v15   ;;  %v1823_v47 = vpop.f32.mrb[25].mxu1  ;;  %v1852_v45 = vsub.f32 %v3975_v20, %v6009_v29 }
 0x462   : > { %3799 = vst [vmem:[%s5944_s13 + $0x50] sm:$0xff] %v3683_v56   ;;  %v3976_v4 = vpop.f32.mrb[26].mxu1  ;;  %v1850_v2 = vsub.f32 %v1823_v47, %v6014_v41 }
 0x463   : > { %v1853_v40 = vsub.f32 %v3976_v4, %v6011_v19  ;;  %v1826_v16 = vpop.f32.mrb[27].mxu1 }
 0x464   : > { %v1851_v5 = vsub.f32 %v1826_v16, %v6016_v21 }
 0x465   : > { %v3668_v22 = vpack.c.bf16 %v1853_v40, %v1852_v45 }
 0x466   : > { %v3663_v30 = vpack.c.bf16 %v1851_v5, %v1850_v2 }
 0x467   : > { %3796 = vst [vmem:[%s5944_s13 + $0x38] sm:$0xff] %v3668_v22  }
 0x468   : > { %3795 = vst [vmem:[%s5944_s13 + $0x30] sm:$0xff] %v3663_v30  }
 0x473   : > { %v4007_v0 = vpop.f32.mrb[20].mxu0 }
 0x474   : > { %v2195_v28 = vpop.f32.mrb[21].mxu0  ;;  %v2236_v53 = vsub.f32 %v4007_v0, %v5983_v32 }
 0x475   : > { %v4008_v50 = vpop.f32.mrb[22].mxu0  ;;  %v2234_v33 = vsub.f32 %v2195_v28, %v5985_v3 }
 0x476   : > { %v2237_v25 = vsub.f32 %v4008_v50, %v5987_v35  ;;  %v2198_v8 = vpop.f32.mrb[23].mxu0 }
 0x477   : > { %v2235_v1 = vsub.f32 %v2198_v8, %v5990_v36 }
 0x478   : > { %v3698_v17 = vpack.c.bf16 %v2237_v25, %v2236_v53 }
 0x479   : > { %v3693_v55 = vpack.c.bf16 %v2235_v1, %v2234_v33 }
 0x47a   : > { %3802 = vst [vmem:[%s5944_s13 + $0x68] sm:$0xff] %v3698_v17  }
 0x47b   : > { %3801 = vst [vmem:[%s5944_s13 + $0x60] sm:$0xff] %v3693_v55   ;;  %v4011_v7 = vpop.f32.mrb[24].mxu0 }
 0x47c   : > { %v2211_v54 = vpop.f32.mrb[25].mxu0  ;;  %v2240_v63 = vsub.f32 %v4011_v7, %v6009_v29 }
 0x47d   : > { %v4012_v9 = vpop.f32.mrb[26].mxu0  ;;  %v2238_v44 = vsub.f32 %v2211_v54, %v6014_v41 }
 0x47e   : > { %v2241_v27 = vsub.f32 %v4012_v9, %v6011_v19  ;;  %v2214_v42 = vpop.f32.mrb[27].mxu0 }
 0x47f   : > { %v2239_v11 = vsub.f32 %v2214_v42, %v6016_v21 }
 0x480   : > { %v3708_v18 = vpack.c.bf16 %v2241_v27, %v2240_v63 }
 0x481   : > { %v3703_v49 = vpack.c.bf16 %v2239_v11, %v2238_v44 }
 0x482   : > { %3804 = vst [vmem:[%s5944_s13 + $0x78] sm:$0xff] %v3708_v18  }
 0x483   : > { %3803 = vst [vmem:[%s5944_s13 + $0x70] sm:$0xff] %v3703_v49  }
 0x49d   : > { %v4035_v46 = vpop.f32.mrb[28].mxu1 }
 0x49e   : > { %v2540_v37 = vpop.f32.mrb[29].mxu1  ;;  %v2605_v52 = vsub.f32 %v4035_v46, %v5912_v12 }
 0x49f   : > { %v4036_v48 = vpop.f32.mrb[30].mxu1  ;;  %v2603_v38 = vsub.f32 %v2540_v37, %v5918_v43 }
 0x4a0   : > { %v2606_v58 = vsub.f32 %v4036_v48, %v5914_v34  ;;  %v2543_v24 = vpop.f32.mrb[31].mxu1 }
 0x4a1   : > { %v2604_v51 = vsub.f32 %v2543_v24, %v5920_v62 }
 0x4a2   : > { %v3718_v39 = vpack.c.bf16 %v2606_v58, %v2605_v52 }
 0x4a3   : > { %v3713_v23 = vpack.c.bf16 %v2604_v51, %v2603_v38  ;;  %v4071_v13 = vpop.f32.mrb[28].mxu0 }
 0x4a4   : > { %3806 = vst [vmem:[%s5944_s13 + $0x88] sm:$0xff] %v3718_v39   ;;  %v2921_v61 = vpop.f32.mrb[29].mxu0  ;;  %v2986_v14 = vsub.f32 %v4071_v13, %v5912_v12 }
 0x4a5   : > { %3805 = vst [vmem:[%s5944_s13 + $0x80] sm:$0xff] %v3713_v23   ;;  %v4039_v10 = vpop.f32.mrb[32].mxu1  ;;  %v4072_v6 = vpop.f32.mrb[30].mxu0  ;;  %v2984_v20 = vsub.f32 %v2921_v61, %v5918_v43 }
 0x4a6   : > { %v2987_v31 = vsub.f32 %v4072_v6, %v5914_v34  ;;  %v2556_v15 = vpop.f32.mrb[33].mxu1  ;;  %v2924_v56 = vpop.f32.mrb[31].mxu0  ;;  %v2609_v45 = vsub.f32 %v4039_v10, %v5941_v59 }
 0x4a7   : > { %v2985_v47 = vsub.f32 %v2924_v56, %v5920_v62  ;;  %v4040_v4 = vpop.f32.mrb[34].mxu1  ;;  %v2607_v12 = vsub.f32 %v2556_v15, %v5948_v26 }
 0x4a8   : > { %v3758_v40 = vpack.c.bf16 %v2987_v31, %v2986_v14  ;;  %v2610_v16 = vsub.f32 %v4040_v4, %v5950_v60  ;;  %v2559_v2 = vpop.f32.mrb[35].mxu1 }
 0x4a9   : > { %v3753_v5 = vpack.c.bf16 %v2985_v47, %v2984_v20  ;;  %v2608_v34 = vsub.f32 %v2559_v2, %v5957_v57 }
 0x4aa   : > { %3814 = vst [vmem:[%s5944_s13 + $0xc8] sm:$0xff] %v3758_v40   ;;  %v3728_v22 = vpack.c.bf16 %v2610_v16, %v2609_v45 }
 0x4ab   : > { %3813 = vst [vmem:[%s5944_s13 + $0xc0] sm:$0xff] %v3753_v5   ;;  %v3723_v30 = vpack.c.bf16 %v2608_v34, %v2607_v12  ;;  %v4075_v43 = vpop.f32.mrb[32].mxu0 }
 0x4ac   : > { %3808 = vst [vmem:[%s5944_s13 + $0x98] sm:$0xff] %v3728_v22   ;;  %v2937_v62 = vpop.f32.mrb[33].mxu0  ;;  %v2990_v50 = vsub.f32 %v4075_v43, %v5941_v59 }
 0x4ad   : > { %3807 = vst [vmem:[%s5944_s13 + $0x90] sm:$0xff] %v3723_v30   ;;  %v4043_v0 = vpop.f32.mrb[36].mxu1  ;;  %v4076_v28 = vpop.f32.mrb[34].mxu0  ;;  %v2988_v33 = vsub.f32 %v2937_v62, %v5948_v26 }
 0x4ae   : > { %v2991_v53 = vsub.f32 %v4076_v28, %v5950_v60  ;;  %v2572_v25 = vpop.f32.mrb[37].mxu1  ;;  %v2940_v8 = vpop.f32.mrb[35].mxu0  ;;  %v2613_v55 = vsub.f32 %v4043_v0, %v5983_v32 }
 0x4af   : > { %v2989_v1 = vsub.f32 %v2940_v8, %v5957_v57  ;;  %v4044_v17 = vpop.f32.mrb[38].mxu1  ;;  %v2611_v59 = vsub.f32 %v2572_v25, %v5985_v3 }
 0x4b0   : > { %v3768_v7 = vpack.c.bf16 %v2991_v53, %v2990_v50  ;;  %v2614_v54 = vsub.f32 %v4044_v17, %v5987_v35  ;;  %v2575_v9 = vpop.f32.mrb[39].mxu1 }
 0x4b1   : > { %v3763_v63 = vpack.c.bf16 %v2989_v1, %v2988_v33  ;;  %v2612_v60 = vsub.f32 %v2575_v9, %v5990_v36 }
 0x4b2   : > { %3816 = vst [vmem:[%s5944_s13 + $0xd8] sm:$0xff] %v3768_v7   ;;  %v3738_v27 = vpack.c.bf16 %v2614_v54, %v2613_v55 }
 0x4b3   : > { %3815 = vst [vmem:[%s5944_s13 + $0xd0] sm:$0xff] %v3763_v63   ;;  %v3733_v42 = vpack.c.bf16 %v2612_v60, %v2611_v59  ;;  %v4079_v26 = vpop.f32.mrb[36].mxu0 }
 0x4b4   : > { %3810 = vst [vmem:[%s5944_s13 + $0xa8] sm:$0xff] %v3738_v27   ;;  %v2953_v57 = vpop.f32.mrb[37].mxu0  ;;  %v2994_v18 = vsub.f32 %v4079_v26, %v5983_v32 }
 0x4b5   : > { %3809 = vst [vmem:[%s5944_s13 + $0xa0] sm:$0xff] %v3733_v42   ;;  %v4047_v44 = vpop.f32.mrb[40].mxu1  ;;  %v4080_v11 = vpop.f32.mrb[38].mxu0  ;;  %v2992_v48 = vsub.f32 %v2953_v57, %v5985_v3 }
 0x4b6   : > { %v2995_v49 = vsub.f32 %v4080_v11, %v5987_v35  ;;  %v2588_v46 = vpop.f32.mrb[41].mxu1  ;;  %v2956_v37 = vpop.f32.mrb[39].mxu0  ;;  %v2617_v24 = vsub.f32 %v4047_v44, %v6009_v29 }
 0x4b7   : > { %v2993_v52 = vsub.f32 %v2956_v37, %v5990_v36  ;;  %v4048_v58 = vpop.f32.mrb[42].mxu1  ;;  %v2615_v39 = vsub.f32 %v2588_v46, %v6014_v41 }
 0x4b8   : > { %v3778_v38 = vpack.c.bf16 %v2995_v49, %v2994_v18  ;;  %v2618_v51 = vsub.f32 %v4048_v58, %v6011_v19  ;;  %v2591_v32 = vpop.f32.mrb[43].mxu1 }
 0x4b9   : > { %v3773_v35 = vpack.c.bf16 %v2993_v52, %v2992_v48  ;;  %v2616_v23 = vsub.f32 %v2591_v32, %v6016_v21 }
 0x4ba   : > { %3818 = vst [vmem:[%s5944_s13 + $0xe8] sm:$0xff] %v3778_v38   ;;  %v3748_v13 = vpack.c.bf16 %v2618_v51, %v2617_v24 }
 0x4bb   : > { %3817 = vst [vmem:[%s5944_s13 + $0xe0] sm:$0xff] %v3773_v35   ;;  %v3743_v3 = vpack.c.bf16 %v2616_v23, %v2615_v39  ;;  %v4083_v36 = vpop.f32.mrb[40].mxu0 }
 0x4bc   : > { %3812 = vst [vmem:[%s5944_s13 + $0xb8] sm:$0xff] %v3748_v13   ;;  %v2969_v61 = vpop.f32.mrb[41].mxu0  ;;  %v2998_v6 = vsub.f32 %v4083_v36, %v6009_v29 }
 0x4bd   : > { %3811 = vst [vmem:[%s5944_s13 + $0xb0] sm:$0xff] %v3743_v3   ;;  %v4084_v10 = vpop.f32.mrb[42].mxu0  ;;  %v2996_v15 = vsub.f32 %v2969_v61, %v6014_v41 }
 0x4be   : > { %v2999_v14 = vsub.f32 %v4084_v10, %v6011_v19  ;;  %v2972_v31 = vpop.f32.mrb[43].mxu0 }
 0x4bf   : > { %v2997_v56 = vsub.f32 %v2972_v31, %v6016_v21 }
 0x4c0   : > { %v3788_v20 = vpack.c.bf16 %v2999_v14, %v2998_v6 }
 0x4c1   : > { %v3783_v47 = vpack.c.bf16 %v2997_v56, %v2996_v15 }
 0x4c2   : > { %3820 = vst [vmem:[%s5944_s13 + $0xf8] sm:$0xff] %v3788_v20  }
 0x4c3   : > { %3819 = vst [vmem:[%s5944_s13 + $0xf0] sm:$0xff] %v3783_v47  }
 0x4c4   : > { %4675 = shalt.err (!%p4672_p2)
}
 0x4c5   : > { %s4676_s28 = scalar_lea.hbm %s6089_s29, 4096  ;;  %s4680_s7 = scalar_lea.hbm %s6274_s10, 8192 }
 0x4c6   : > { %p4677_p4 = scmp.ne.s32.totalorder %s6089_s29, %s4676_s28  ;;  %p4681_p7 = scmp.lt.u32.totalorder %s6089_s29, %s6274_s10 }
 0x4c7   : > { %p4682_p9 = scmp.lt.u32.totalorder %s4680_s7, %s4676_s28  ;;  %p4684_p1 = scmp.lt.u32.totalorder %s4676_s28, %s6089_s29 }
 0x4c8   : > { %p4678_p8 = pnand %p4677_p4, %p6275_p5 }
 0x4c9   : > { %p4683_p10 = por %p4682_p9, %p4681_p7 }
 0x4ca   : > { %p4679_p3 = pneg %p4678_p8 }
 0x4cb   : > { %p4685_p0 = por %p4684_p1, %p4683_p10 }
 0x4cd   : > { %p4686_p6 = pnand %p4685_p0, %p4679_p3 }
 0x4cf   : > { %4689 = shalt.err (!%p4686_p6)
}
 0x4d0   : > { %s4800_s17 = smov 64   ;;  %s4801_s14 = smov 4  }
 0x4d1   : > { %4199 = dma.vmem_to_hbm [thread:$0]  (%p6275_p5), %s6091_s2, 4096, %s6089_s29, %s3082_s12, %s4800_s17, %s4800_s17, %s4801_s14  }
 0x4d2 PF: > { %s6276_s13 = sld [smem:[#allocation30_spill]]  ;;  %s6277_s11 = sld [smem:[#allocation36_spill]] }
 0x4d3   : > { %p6279_p11 = scmp.ge.s32.totalorder %s4772_s22, 2 }
 0x4d8   : > { %s3113_s25 = sand.u32 1, %s6276_s13   ;;  %p6278_p13 = scmp.ne.s32.totalorder %s6277_s11, 0 }
 0x4d9   : > { %s3114_s15 = scalar_lea.sflag [#allocation4], %s3113_s25 }
 0x4da   : > { %p4237_p12 = pnand %p6279_p11, %p6278_p13 }
 0x4dc   : > { %4747 = dma.done.wait (!%p4237_p12), %s3114_s15, 4096  }
 0x4dd   : > { %4749 = vsyncadd (!%p4237_p12), %s3114_s15, 4294963200  ;;  %s34_s22 = sadd.s32 1, %s4772_s22   ;;  %s6280_s27 = sld [smem:[#allocation31_spill]] }
 0x4de   : > { %p31_p2 = scmp.ge.s32.totalorder %s34_s22, 4   ;;  %s6281_s19 = sld [smem:[#allocation35_spill]] }
 0x4df   : > { %s6282_s30 = sld [smem:[#allocation34_spill]]  ;;  %s6283_s17 = smov %s4756_s18 }
 0x4e0   : > { %s6285_s20 = smov %s4768_s21  ;;  %33 = sbr.rel (!%p31_p2) target bundleno = 22 (0x16), region = 172 }
 0x4e3   : > { %s6284_s18 = smov %s6280_s27 }
 0x4e5   : > { %s6286_s21 = smov %s6282_s30 }
 0x4e7   :  { %3119 = vsyncpa [#allocation3], 1 }
 0x4e8   :  { %3121 = vsyncpa [#allocation3 + $0x1], 1 }
 0x4e9   :  { %3122 = vsyncpa [#allocation6], 1 }
 0x4ea   :  { %3124 = vsyncpa [#allocation6 + $0x1], 1 }
 0x4eb   :  { %3125 = vsyncpa [#allocation9], 1 }
 0x4ec   :  { %3126 = vsyncpa [#allocation12], 1 }
 0x4ed   :  { %3127 = vsyncpa [#allocation15], 1 }
 0x4ee   :  { %3128 = vsyncpa [#allocation18], 1 }
 0x4ef   :  { %3129 = vsyncpa [#allocation4], 1 }
 0x4f0   :  { %3131 = vsyncpa [#allocation4 + $0x1], 1 }

</bundles_post_ra>
